<compile_context>
chip_gen: v6e
topology: v6e:2x2x1
jax: 0.10.0
libtpu: 0.0.40
codegen_flags: <defaults>
</compile_context>

<pallas_src>
import jax
import jax.numpy as jnp
import numpy as np
from jax.experimental import pallas as pl
from jax.experimental.pallas import tpu as pltpu


# ----------------------------- glue (plain JAX) -----------------------------

def block_images(x, patch_size):
    """'n (gh fh) (gw fw) (gd fd) c -> n (gh gw gd) (fh fw fd) c'."""
    n, H, W, D, C = x.shape
    fh, fw, fd = patch_size
    gh, gw, gd = H // fh, W // fw, D // fd
    x = x.reshape(n, gh, fh, gw, fw, gd, fd, C)
    x = x.transpose(0, 1, 3, 5, 2, 4, 6, 7)
    return x.reshape(n, gh * gw * gd, fh * fw * fd, C)


def unblock_images(x, grid_size, patch_size):
    """'n (gh gw gd) (fh fw fd) c -> n (gh fh) (gw fw) (gd fd) c'."""
    n, G, P, C = x.shape
    gh, gw, gd = grid_size
    fh, fw, fd = patch_size
    x = x.reshape(n, gh, gw, gd, fh, fw, fd, C)
    x = x.transpose(0, 1, 4, 2, 5, 3, 6, 7)
    return x.reshape(n, gh * fh, gw * fw, gd * fd, C)


def block_images_batched(x, patch_size, bblk):
    """block_images that also folds `bblk` batch elems into the lane dim:
    (n, H, W, D, C) -> (n//bblk, G, bblk*P*C) with lane order (b, p, c).
    Still a single transpose -- no extra HBM relayout vs. block_images."""
    n, H, W, D, C = x.shape
    fh, fw, fd = patch_size
    gh, gw, gd = H // fh, W // fw, D // fd
    nb = n // bblk
    x = x.reshape(nb, bblk, gh, fh, gw, fw, gd, fd, C)
    x = x.transpose(0, 2, 4, 6, 1, 3, 5, 7, 8)   # (nb, gh, gw, gd, b, fh, fw, fd, C)
    return x.reshape(nb, gh * gw * gd, bblk * fh * fw * fd * C)


def unblock_images_batched(x, grid_size, patch_size, bblk):
    """Inverse of block_images_batched: (nb, G, bblk*P*C) -> (nb*bblk, H, W, D, C)."""
    nb, G, L = x.shape
    gh, gw, gd = grid_size
    fh, fw, fd = patch_size
    C = L // (bblk * fh * fw * fd)
    x = x.reshape(nb, gh, gw, gd, bblk, fh, fw, fd, C)
    x = x.transpose(0, 4, 1, 5, 2, 6, 3, 7, 8)
    return x.reshape(nb * bblk, gh * fh, gw * fw, gd * fd, C)


# ------------------------------- kernel math --------------------------------

_SQRT_2_OVER_PI = 0.7978845608028654


def _gelu_tanh(x):
    # TODO(synk): tanh-approx GELU (|err| ~1e-3 vs torch.nn.GELU exact erf);
    # tanh routes to the otherwise-idle EUP slot instead of a long VALU poly.
    return 0.5 * x * (1.0 + jnp.tanh(_SQRT_2_OVER_PI * (x + 0.044715 * (x * x * x))))


def _choose_bblk(n, G, P, C, Ch, budget_bytes=16 << 20, max_lanes=2048):
    """Pick how many batch elements to fold into the lane dim per grid step.

    Preference: smallest fold that makes the I/O lane width a multiple of 128
    (lane-dense, unmasked stores), grown while the f32 working set (I/O tiles,
    widest intermediate, block-diagonal weights) fits a conservative VMEM
    budget.  Honest fallback: degrade to Bblk=1 rather than overshoot."""
    base = P * C
    b_align = 1
    while (b_align * base) % 128 != 0 and b_align < max(n, 1):
        b_align += 1
    if (b_align * base) % 128 != 0:
        b_align = 1                       # n too small to lane-align; accept masked stores

    def est(b):
        lc, lh = b * P * C, b * P * Ch                    # lane widths (chan / hidden)
        io = G * lc * 4                                   # one x / out tile (f32)
        inter = G * 2 * lh * 4                            # widest live intermediate (y)
        wts = 4 * (lc * 2 * lh + lc * lc + lh * lh + lh * lc) + 4 * G * (G + 1)
        return 4 * io + 3 * inter + 2 * wts               # dbl-buffered I/O+wts, temps

    best = 1
    b = b_align
    while b <= max(n, 1) and b * base <= max_lanes:
        if est(b) <= budget_bytes:
            best = b
        b += b_align
    if est(best) > budget_bytes:
        best = 1   # TODO(synk): for very large P*C a patch-dim (P) split is needed here.
    return best


def _vmem_limit_bytes():
    # Per-generation scoped-VMEM limit (review): half of physical VMEM
    # (64 MiB on v5e/v6e, 32 MiB on v7x); conservative 32 MiB fallback.
    try:
        phys = pltpu.get_tpu_info().vmem_capacity_bytes
    except Exception:
        phys = 64 << 20
    return int(min(max(32 << 20, phys // 2), 64 << 20))


# ------------------------------ pallas wrapper -------------------------------

def grid_gmlp_pallas(x, params, grid_size):
    gh, gw, gd = grid_size
    n, h, w, d, c = x.shape
    xp = jnp.pad(x, ((0, 0), (0, (-h) % gh), (0, (-w) % gw), (0, (-d) % gd), (0, 0)))
    fh, fw, fd = xp.shape[1] // gh, xp.shape[2] // gw, xp.shape[3] // gd
    G = gh * gw * gd
    P = fh * fw * fd

    (g1, b1, wu, bu, wv, bv, g2, b2, wg, bg, wo, bo) = params
    Ch = wu.shape[1]
    f32 = jnp.float32

    bblk = _choose_bblk(n, G, P, c, Ch)
    n_pad = -(-n // bblk) * bblk
    nb = n_pad // bblk
    if n_pad != n:
        # Zero-padded batch rows are computed (finite: var+eps > 0) and cropped.
        xp = jnp.pad(xp, ((0, n_pad - n), (0, 0), (0, 0), (0, 0), (0, 0)))

    # HBM-facing slab: (nb, G, bblk*P*C), lane order (b, p, c) -> lane-dense I/O.
    xk = block_images_batched(xp, (fh, fw, fd), bblk)
    R = bblk * P                       # tokens folded into lanes per grid row
    RC, RH = R * c, R * Ch

    # Block-diagonal channel operators: keep the whole kernel body in the wide
    # (G, lanes) layout -> zero in-kernel relayouts, full lane occupancy.
    eye_r = jnp.eye(R, dtype=f32)
    wuv_bd = jnp.concatenate([jnp.kron(eye_r, wu), jnp.kron(eye_r, wv)], axis=1)  # (RC, 2*RH)
    a1_bd = jnp.kron(eye_r, jnp.full((c, c), 1.0 / c, f32))     # per-token channel-mean bcast
    a2_bd = jnp.kron(eye_r, jnp.full((Ch, Ch), 1.0 / Ch, f32))
    wo_bd = jnp.kron(eye_r, wo)                                 # (RH, RC)

    # Pack the 1-row affine constants into one (8, Wmax) buffer (fewer inputs).
    wmax = max(RC, 2 * RH)
    g1_t = jnp.tile(g1, (1, R))
    b1_t = jnp.tile(b1, (1, R))
    buv_t = jnp.concatenate([jnp.tile(bu, (1, R)), jnp.tile(bv, (1, R))], axis=1)
    g2_t = jnp.tile(g2, (1, R))
    b2_t = jnp.tile(b2, (1, R))
    bo_t = jnp.tile(bo, (1, R))

    def _pad_row(r):
        return jnp.pad(r.astype(f32), ((0, 0), (0, wmax - r.shape[1])))

    rows = jnp.concatenate(
        [_pad_row(r) for r in (g1_t, b1_t, buv_t, g2_t, b2_t, bo_t)]
        + [jnp.zeros((2, wmax), f32)], axis=0)                  # (8, wmax)

    def kernel(x_ref, rows_ref, wuv_ref, a1_ref, a2_ref, wg_ref, bg_ref, wo_ref, o_ref):
        rows_v = rows_ref[...]
        g1r, b1r = rows_v[0:1, :RC], rows_v[1:2, :RC]
        buvr = rows_v[2:3, :2 * RH]
        g2r, b2r = rows_v[3:4, :RH], rows_v[4:5, :RH]
        bor = rows_v[5:6, :RC]

        xw = x_ref[...].astype(f32)                             # (G, RC), wide layout

        # LayerNorm over channels (eps=1e-5): per-token mean/var broadcast via
        # the block-diagonal averaging matmul -> stays in the wide layout.
        mu = jnp.dot(xw, a1_ref[...], preferred_element_type=f32)
        dx = xw - mu
        var = jnp.dot(dx * dx, a1_ref[...], preferred_element_type=f32)
        xn = dx * jax.lax.rsqrt(var + 1e-5) * g1r + b1r

        # Fused in_project (u|v) + bias + GELU once on the full (G, 2*RH) slab.
        y = _gelu_tanh(jnp.dot(xn, wuv_ref[...], preferred_element_type=f32) + buvr)
        u = y[:, :RH]                                           # 128-aligned lane slices
        v = y[:, RH:]

        # GridGatingUnit: LayerNorm(v) over channels ...
        mv = jnp.dot(v, a2_ref[...], preferred_element_type=f32)
        dv = v - mv
        vv = jnp.dot(dv * dv, a2_ref[...], preferred_element_type=f32)
        vn = dv * jax.lax.rsqrt(vv + 1e-5) * g2r + b2r

        # ... then mix tokens along the grid axis: one MXU dot, K = G,
        # N = bblk*P*Ch (all folded batch elements at once).
        vm = jnp.dot(wg_ref[...], vn, preferred_element_type=f32) + bg_ref[...]

        gated = u * (vm + 1.0)

        # out_project (Ch -> C per token); dropout(rate=0) == identity.
        out = jnp.dot(gated, wo_ref[...], preferred_element_type=f32) + bor

        # Residual: re-read x_ref (cheap VMEM reload, keeps live ranges short).
        o_ref[...] = (out + x_ref[...].astype(f32)).astype(o_ref.dtype)

    def wspec(shape):
        return pl.BlockSpec(shape, lambda i: (0, 0))

    x_spec = pl.BlockSpec((None, G, RC), lambda i: (i, 0, 0))
    o_spec = pl.BlockSpec((None, G, RC), lambda i: (i, 0, 0))

    out = pl.pallas_call(
        kernel,
        out_shape=jax.ShapeDtypeStruct((nb, G, RC), x.dtype),
        grid_spec=pltpu.PrefetchScalarGridSpec(
            num_scalar_prefetch=0,
            grid=(nb,),
            in_specs=[
                x_spec,
                wspec(rows.shape),
                wspec(wuv_bd.shape),
                wspec(a1_bd.shape),
                wspec(a2_bd.shape),
                wspec(wg.shape),
                wspec(bg.shape),
                wspec(wo_bd.shape),
            ],
            out_specs=o_spec,
        ),
        compiler_params=pltpu.CompilerParams(
            dimension_semantics=("parallel",),
            vmem_limit_bytes=_vmem_limit_bytes()),
    )(xk, rows, wuv_bd, a1_bd, a2_bd, wg, bg, wo_bd)

    out = unblock_images_batched(out, grid_size, (fh, fw, fd), bblk)
    return out[:n, :h, :w, :d, :]


# --------------------------- pure-JAX reference ------------------------------

def grid_gmlp_reference(x, params, grid_size):
    gh, gw, gd = grid_size
    n, h, w, d, c = x.shape
    xp = jnp.pad(x, ((0, 0), (0, (-h) % gh), (0, (-w) % gw), (0, (-d) % gd), (0, 0)))
    fh, fw, fd = xp.shape[1] // gh, xp.shape[2] // gw, xp.shape[3] // gd
    xb = block_images(xp, (fh, fw, fd))           # (n, G, P, C)
    shortcut = xb
    (g1, b1, wu, bu, wv, bv, g2, b2, wg, bg, wo, bo) = params

    mu = xb.mean(-1, keepdims=True)
    var = ((xb - mu) ** 2).mean(-1, keepdims=True)
    xn = (xb - mu) * jax.lax.rsqrt(var + 1e-5) * g1[0] + b1[0]

    u = jax.nn.gelu(xn @ wu + bu[0], approximate=False)
    v = jax.nn.gelu(xn @ wv + bv[0], approximate=False)

    mv = v.mean(-1, keepdims=True)
    vv = ((v - mv) ** 2).mean(-1, keepdims=True)
    vn = (v - mv) * jax.lax.rsqrt(vv + 1e-5) * g2[0] + b2[0]

    vm = jnp.einsum('gk,nkpc->ngpc', wg, vn) + bg[:, 0][None, :, None, None]
    out = (u * (vm + 1.0)) @ wo + bo[0]
    out = out + shortcut
    out = unblock_images(out, grid_size, (fh, fw, fd))
    return out[:, :h, :w, :d, :]


# ----------------------------------- main ------------------------------------

if __name__ == "__main__":
    B, H, W, D, C = 2, 8, 7, 8, 8        # W=7 exercises the pad/crop path
    grid_size = (4, 4, 4)
    factor = 2
    G = grid_size[0] * grid_size[1] * grid_size[2]
    Ch = C * factor // 2

    key = jax.random.PRNGKey(0)
    ks = jax.random.split(key, 14)

    x = jax.random.normal(ks[0], (B, H, W, D, C), jnp.float32)

    g1 = 1.0 + 0.1 * jax.random.normal(ks[1], (1, C), jnp.float32)
    b1 = 0.1 * jax.random.normal(ks[2], (1, C), jnp.float32)
    wu = jax.random.normal(ks[3], (C, Ch), jnp.float32) / np.sqrt(C)
    bu = 0.1 * jax.random.normal(ks[4], (1, Ch), jnp.float32)
    wv = jax.random.normal(ks[5], (C, Ch), jnp.float32) / np.sqrt(C)
    bv = 0.1 * jax.random.normal(ks[6], (1, Ch), jnp.float32)
    g2 = 1.0 + 0.1 * jax.random.normal(ks[7], (1, Ch), jnp.float32)
    b2 = 0.1 * jax.random.normal(ks[8], (1, Ch), jnp.float32)
    wg = jax.random.normal(ks[9], (G, G), jnp.float32) / np.sqrt(G)
    bg = 0.1 * jax.random.normal(ks[10], (G, 1), jnp.float32)
    wo = jax.random.normal(ks[11], (Ch, C), jnp.float32) / np.sqrt(Ch)
    bo = 0.1 * jax.random.normal(ks[12], (1, C), jnp.float32)

    params = (g1, b1, wu, bu, wv, bv, g2, b2, wg, bg, wo, bo)

    out = jax.block_until_ready(grid_gmlp_pallas(x, params, grid_size))
    ref = jax.block_until_ready(grid_gmlp_reference(x, params, grid_size))

    assert out.shape == (B, H, W, D, C), out.shape
    np.testing.assert_allclose(np.asarray(out), np.asarray(ref), rtol=5e-2, atol=5e-2)
    print("KERNEL_OK")
</pallas_src>

<mosaic_0001>
module attributes {stable_mosaic.version = 11 : i64} {
  func.func @kernel(%arg0: i32, %arg1: memref<1x64x128xf32, #tpu.memory_space<vmem>>, %arg2: memref<8x256xf32, #tpu.memory_space<vmem>>, %arg3: memref<128x256xf32, #tpu.memory_space<vmem>>, %arg4: memref<128x128xf32, #tpu.memory_space<vmem>>, %arg5: memref<128x128xf32, #tpu.memory_space<vmem>>, %arg6: memref<64x64xf32, #tpu.memory_space<vmem>>, %arg7: memref<64x1xf32, #tpu.memory_space<vmem>>, %arg8: memref<128x128xf32, #tpu.memory_space<vmem>>, %arg9: memref<1x64x128xf32, #tpu.memory_space<vmem>>) attributes {dimension_semantics = [#tpu.dimension_semantics<parallel>], iteration_bounds = array<i64: 1>, scalar_prefetch = 0 : i64, scratch_operands = 0 : i64, tpu.core_type = #tpu.core_type<tc>, window_params = [{transform_indices = @transform_0, window_bounds = array<i64: 1, 64, 128>}, {pipeline_mode = #tpu.pipeline_mode<synchronous>, transform_indices = @transform_1, window_bounds = array<i64: 8, 256>}, {pipeline_mode = #tpu.pipeline_mode<synchronous>, transform_indices = @transform_2, window_bounds = array<i64: 128, 256>}, {pipeline_mode = #tpu.pipeline_mode<synchronous>, transform_indices = @transform_3, window_bounds = array<i64: 128, 128>}, {pipeline_mode = #tpu.pipeline_mode<synchronous>, transform_indices = @transform_4, window_bounds = array<i64: 128, 128>}, {pipeline_mode = #tpu.pipeline_mode<synchronous>, transform_indices = @transform_5, window_bounds = array<i64: 64, 64>}, {pipeline_mode = #tpu.pipeline_mode<synchronous>, transform_indices = @transform_6, window_bounds = array<i64: 64, 1>}, {pipeline_mode = #tpu.pipeline_mode<synchronous>, transform_indices = @transform_7, window_bounds = array<i64: 128, 128>}, {transform_indices = @transform_8, window_bounds = array<i64: 1, 64, 128>}]} {
    %c0 = arith.constant 0 : index
    %c0_0 = arith.constant 0 : index
    %0 = vector.load %arg2[%c0, %c0_0] : memref<8x256xf32, #tpu.memory_space<vmem>>, vector<8x256xf32>
    %1 = vector.extract_strided_slice %0 {offsets = [0, 0], sizes = [1, 128], strides = [1, 1]} : vector<8x256xf32> to vector<1x128xf32>
    %2 = vector.extract_strided_slice %0 {offsets = [1, 0], sizes = [1, 128], strides = [1, 1]} : vector<8x256xf32> to vector<1x128xf32>
    %3 = vector.extract_strided_slice %0 {offsets = [2, 0], sizes = [1, 256], strides = [1, 1]} : vector<8x256xf32> to vector<1x256xf32>
    %4 = vector.extract_strided_slice %0 {offsets = [3, 0], sizes = [1, 128], strides = [1, 1]} : vector<8x256xf32> to vector<1x128xf32>
    %5 = vector.extract_strided_slice %0 {offsets = [4, 0], sizes = [1, 128], strides = [1, 1]} : vector<8x256xf32> to vector<1x128xf32>
    %6 = vector.extract_strided_slice %0 {offsets = [5, 0], sizes = [1, 128], strides = [1, 1]} : vector<8x256xf32> to vector<1x128xf32>
    %c0_1 = arith.constant 0 : index
    %c0_2 = arith.constant 0 : index
    %c0_3 = arith.constant 0 : index
    %7 = vector.load %arg1[%c0_1, %c0_2, %c0_3] : memref<1x64x128xf32, #tpu.memory_space<vmem>>, vector<1x64x128xf32>
    %8 = vector.shape_cast %7 : vector<1x64x128xf32> to vector<64x128xf32>
    %c0_4 = arith.constant 0 : index
    %c0_5 = arith.constant 0 : index
    %9 = vector.load %arg4[%c0_4, %c0_5] : memref<128x128xf32, #tpu.memory_space<vmem>>, vector<128x128xf32>
    %cst = arith.constant dense<0.000000e+00> : vector<64x128xf32>
    %10 = tpu.matmul %8, %9, %cst {dimension_numbers = #tpu.dot_dimension_numbers<[1], [0], [0], [1], [0, 0, 1, 1], [], []>} : vector<64x128xf32>, vector<128x128xf32>, vector<64x128xf32> -> vector<64x128xf32>
    %11 = arith.subf %8, %10 : vector<64x128xf32>
    %12 = arith.mulf %11, %11 : vector<64x128xf32>
    %c0_6 = arith.constant 0 : index
    %c0_7 = arith.constant 0 : index
    %13 = vector.load %arg4[%c0_6, %c0_7] : memref<128x128xf32, #tpu.memory_space<vmem>>, vector<128x128xf32>
    %cst_8 = arith.constant dense<0.000000e+00> : vector<64x128xf32>
    %14 = tpu.matmul %12, %13, %cst_8 {dimension_numbers = #tpu.dot_dimension_numbers<[1], [0], [0], [1], [0, 0, 1, 1], [], []>} : vector<64x128xf32>, vector<128x128xf32>, vector<64x128xf32> -> vector<64x128xf32>
    %cst_9 = arith.constant 9.99999974E-6 : f32
    %15 = vector.broadcast %cst_9 : f32 to vector<64x128xf32>
    %16 = arith.addf %14, %15 : vector<64x128xf32>
    %17 = math.rsqrt %16 : vector<64x128xf32>
    %18 = arith.mulf %11, %17 : vector<64x128xf32>
    %19 = vector.broadcast %1 : vector<1x128xf32> to vector<64x128xf32>
    %20 = arith.mulf %18, %19 : vector<64x128xf32>
    %21 = vector.broadcast %2 : vector<1x128xf32> to vector<64x128xf32>
    %22 = arith.addf %20, %21 : vector<64x128xf32>
    %c0_10 = arith.constant 0 : index
    %c0_11 = arith.constant 0 : index
    %23 = vector.load %arg3[%c0_10, %c0_11] : memref<128x256xf32, #tpu.memory_space<vmem>>, vector<128x256xf32>
    %cst_12 = arith.constant dense<0.000000e+00> : vector<64x256xf32>
    %24 = tpu.matmul %22, %23, %cst_12 {dimension_numbers = #tpu.dot_dimension_numbers<[1], [0], [0], [1], [0, 0, 1, 1], [], []>} : vector<64x128xf32>, vector<128x256xf32>, vector<64x256xf32> -> vector<64x256xf32>
    %25 = vector.broadcast %3 : vector<1x256xf32> to vector<64x256xf32>
    %26 = arith.addf %24, %25 : vector<64x256xf32>
    %cst_13 = arith.constant 5.000000e-01 : f32
    %27 = vector.broadcast %cst_13 : f32 to vector<64x256xf32>
    %28 = arith.mulf %27, %26 : vector<64x256xf32>
    %29 = arith.mulf %26, %26 : vector<64x256xf32>
    %30 = arith.mulf %29, %26 : vector<64x256xf32>
    %cst_14 = arith.constant 4.471500e-02 : f32
    %31 = vector.broadcast %cst_14 : f32 to vector<64x256xf32>
    %32 = arith.mulf %31, %30 : vector<64x256xf32>
    %33 = arith.addf %26, %32 : vector<64x256xf32>
    %cst_15 = arith.constant 0.797884583 : f32
    %34 = vector.broadcast %cst_15 : f32 to vector<64x256xf32>
    %35 = arith.mulf %34, %33 : vector<64x256xf32>
    %36 = math.tanh %35 : vector<64x256xf32>
    %cst_16 = arith.constant 1.000000e+00 : f32
    %37 = vector.broadcast %cst_16 : f32 to vector<64x256xf32>
    %38 = arith.addf %37, %36 : vector<64x256xf32>
    %39 = arith.mulf %28, %38 : vector<64x256xf32>
    %40 = vector.extract_strided_slice %39 {offsets = [0, 0], sizes = [64, 128], strides = [1, 1]} : vector<64x256xf32> to vector<64x128xf32>
    %41 = vector.extract_strided_slice %39 {offsets = [0, 128], sizes = [64, 128], strides = [1, 1]} : vector<64x256xf32> to vector<64x128xf32>
    %c0_17 = arith.constant 0 : index
    %c0_18 = arith.constant 0 : index
    %42 = vector.load %arg5[%c0_17, %c0_18] : memref<128x128xf32, #tpu.memory_space<vmem>>, vector<128x128xf32>
    %cst_19 = arith.constant dense<0.000000e+00> : vector<64x128xf32>
    %43 = tpu.matmul %41, %42, %cst_19 {dimension_numbers = #tpu.dot_dimension_numbers<[1], [0], [0], [1], [0, 0, 1, 1], [], []>} : vector<64x128xf32>, vector<128x128xf32>, vector<64x128xf32> -> vector<64x128xf32>
    %44 = arith.subf %41, %43 : vector<64x128xf32>
    %45 = arith.mulf %44, %44 : vector<64x128xf32>
    %c0_20 = arith.constant 0 : index
    %c0_21 = arith.constant 0 : index
    %46 = vector.load %arg5[%c0_20, %c0_21] : memref<128x128xf32, #tpu.memory_space<vmem>>, vector<128x128xf32>
    %cst_22 = arith.constant dense<0.000000e+00> : vector<64x128xf32>
    %47 = tpu.matmul %45, %46, %cst_22 {dimension_numbers = #tpu.dot_dimension_numbers<[1], [0], [0], [1], [0, 0, 1, 1], [], []>} : vector<64x128xf32>, vector<128x128xf32>, vector<64x128xf32> -> vector<64x128xf32>
    %cst_23 = arith.constant 9.99999974E-6 : f32
    %48 = vector.broadcast %cst_23 : f32 to vector<64x128xf32>
    %49 = arith.addf %47, %48 : vector<64x128xf32>
    %50 = math.rsqrt %49 : vector<64x128xf32>
    %51 = arith.mulf %44, %50 : vector<64x128xf32>
    %52 = vector.broadcast %4 : vector<1x128xf32> to vector<64x128xf32>
    %53 = arith.mulf %51, %52 : vector<64x128xf32>
    %54 = vector.broadcast %5 : vector<1x128xf32> to vector<64x128xf32>
    %55 = arith.addf %53, %54 : vector<64x128xf32>
    %c0_24 = arith.constant 0 : index
    %c0_25 = arith.constant 0 : index
    %56 = vector.load %arg6[%c0_24, %c0_25] : memref<64x64xf32, #tpu.memory_space<vmem>>, vector<64x64xf32>
    %cst_26 = arith.constant dense<0.000000e+00> : vector<64x128xf32>
    %57 = tpu.matmul %56, %55, %cst_26 {dimension_numbers = #tpu.dot_dimension_numbers<[1], [0], [0], [1], [0, 0, 1, 1], [], []>} : vector<64x64xf32>, vector<64x128xf32>, vector<64x128xf32> -> vector<64x128xf32>
    %c0_27 = arith.constant 0 : index
    %c0_28 = arith.constant 0 : index
    %58 = vector.load %arg7[%c0_27, %c0_28] : memref<64x1xf32, #tpu.memory_space<vmem>>, vector<64x1xf32>
    %59 = vector.broadcast %58 : vector<64x1xf32> to vector<64x128xf32>
    %60 = arith.addf %57, %59 : vector<64x128xf32>
    %cst_29 = arith.constant 1.000000e+00 : f32
    %61 = vector.broadcast %cst_29 : f32 to vector<64x128xf32>
    %62 = arith.addf %60, %61 : vector<64x128xf32>
    %63 = arith.mulf %40, %62 : vector<64x128xf32>
    %c0_30 = arith.constant 0 : index
    %c0_31 = arith.constant 0 : index
    %64 = vector.load %arg8[%c0_30, %c0_31] : memref<128x128xf32, #tpu.memory_space<vmem>>, vector<128x128xf32>
    %cst_32 = arith.constant dense<0.000000e+00> : vector<64x128xf32>
    %65 = tpu.matmul %63, %64, %cst_32 {dimension_numbers = #tpu.dot_dimension_numbers<[1], [0], [0], [1], [0, 0, 1, 1], [], []>} : vector<64x128xf32>, vector<128x128xf32>, vector<64x128xf32> -> vector<64x128xf32>
    %66 = vector.broadcast %6 : vector<1x128xf32> to vector<64x128xf32>
    %67 = arith.addf %65, %66 : vector<64x128xf32>
    %c0_33 = arith.constant 0 : index
    %c0_34 = arith.constant 0 : index
    %c0_35 = arith.constant 0 : index
    %68 = vector.load %arg1[%c0_33, %c0_34, %c0_35] : memref<1x64x128xf32, #tpu.memory_space<vmem>>, vector<1x64x128xf32>
    %69 = vector.shape_cast %68 : vector<1x64x128xf32> to vector<64x128xf32>
    %70 = arith.addf %67, %69 : vector<64x128xf32>
    %c0_36 = arith.constant 0 : index
    %c0_37 = arith.constant 0 : index
    %c0_38 = arith.constant 0 : index
    %71 = vector.load %arg9[%c0_36, %c0_37, %c0_38] : memref<1x64x128xf32, #tpu.memory_space<vmem>>, vector<1x64x128xf32>
    %72 = vector.shape_cast %71 : vector<1x64x128xf32> to vector<64x128xf32>
    %73 = vector.shape_cast %70 : vector<64x128xf32> to vector<1x64x128xf32>
    tpu.vector_store %arg9[%c0_36, %c0_37, %c0_38], %73 {strides = array<i32>} : memref<1x64x128xf32, #tpu.memory_space<vmem>>, vector<1x64x128xf32>,
    return
  }
  func.func @transform_0(%arg0: i32) -> (i32, i32, i32) {
    %c0_i32 = arith.constant 0 : i32
    %c0_i32_0 = arith.constant 0 : i32
    %c0_i32_1 = arith.constant 0 : i32
    return %arg0, %c0_i32, %c0_i32_0 : i32, i32, i32
  }
  func.func @transform_1(%arg0: i32) -> (i32, i32) {
    %c0_i32 = arith.constant 0 : i32
    %c0_i32_0 = arith.constant 0 : i32
    %c0_i32_1 = arith.constant 0 : i32
    return %c0_i32, %c0_i32_0 : i32, i32
  }
  func.func @transform_2(%arg0: i32) -> (i32, i32) {
    %c0_i32 = arith.constant 0 : i32
    %c0_i32_0 = arith.constant 0 : i32
    %c0_i32_1 = arith.constant 0 : i32
    return %c0_i32, %c0_i32_0 : i32, i32
  }
  func.func @transform_3(%arg0: i32) -> (i32, i32) {
    %c0_i32 = arith.constant 0 : i32
    %c0_i32_0 = arith.constant 0 : i32
    %c0_i32_1 = arith.constant 0 : i32
    return %c0_i32, %c0_i32_0 : i32, i32
  }
  func.func @transform_4(%arg0: i32) -> (i32, i32) {
    %c0_i32 = arith.constant 0 : i32
    %c0_i32_0 = arith.constant 0 : i32
    %c0_i32_1 = arith.constant 0 : i32
    return %c0_i32, %c0_i32_0 : i32, i32
  }
  func.func @transform_5(%arg0: i32) -> (i32, i32) {
    %c0_i32 = arith.constant 0 : i32
    %c0_i32_0 = arith.constant 0 : i32
    %c0_i32_1 = arith.constant 0 : i32
    return %c0_i32, %c0_i32_0 : i32, i32
  }
  func.func @transform_6(%arg0: i32) -> (i32, i32) {
    %c0_i32 = arith.constant 0 : i32
    %c0_i32_0 = arith.constant 0 : i32
    %c0_i32_1 = arith.constant 0 : i32
    return %c0_i32, %c0_i32_0 : i32, i32
  }
  func.func @transform_7(%arg0: i32) -> (i32, i32) {
    %c0_i32 = arith.constant 0 : i32
    %c0_i32_0 = arith.constant 0 : i32
    %c0_i32_1 = arith.constant 0 : i32
    return %c0_i32, %c0_i32_0 : i32, i32
  }
  func.func @transform_8(%arg0: i32) -> (i32, i32, i32) {
    %c0_i32 = arith.constant 0 : i32
    %c0_i32_0 = arith.constant 0 : i32
    %c0_i32_1 = arith.constant 0 : i32
    return %arg0, %c0_i32, %c0_i32_0 : i32, i32, i32
  }
}

</mosaic_0001>

<bundles_post_ra>
// kernel: tpu_custom_call.1
= control target key start
LH: loop header
LB: loop body
LE: loop exit
PB: predicated region body
PF: predicated region fallthrough
CT: control target
= control target key end

     0   :  { %13 = vsyncpa [#allocation3], 0  ;;  %s2348_s0 = inlined_call_operand.vmem [shape: f32[1,64,128], index: 0, kind: input, shape index: {}]   ;;  %s2349_s1 = inlined_call_operand.hbm [shape: f32[8,256], index: 1, kind: input, shape index: {}]   ;;  %s2350_s2 = inlined_call_operand.hbm [shape: f32[128,256], index: 2, kind: input, shape index: {}]   ;;  %s2351_s3 = inlined_call_operand.hbm [shape: f32[128,128], index: 3, kind: input, shape index: {}]   ;;  %s2352_s4 = inlined_call_operand.hbm [shape: f32[128,128], index: 4, kind: input, shape index: {}]   ;;  %s2353_s5 = inlined_call_operand.hbm [shape: f32[64,64], index: 5, kind: input, shape index: {}]   ;;  %s2354_s6 = inlined_call_operand.vmem [shape: f32[64,1], index: 6, kind: input, shape index: {}]   ;;  %s2355_s7 = inlined_call_operand.hbm [shape: f32[128,128], index: 7, kind: input, shape index: {}]   ;;  %s2356_s8 = inlined_call_operand.hbm [shape: f32[1,64,128], index: 8, kind: output, shape index: {}]  }
   0x1   :  { %14 = vsyncpa [#allocation6], 0 }
   0x2   :  { %15 = vsyncpa [#allocation9], 0 }
   0x3   :  { %16 = vsyncpa [#allocation12], 0 }
   0x4   :  { %17 = vsyncpa [#allocation4], 0  ;;  %s1974_s27 = smov [#allocation5]  }
   0x5   :  { %s35_s28 = sshll.u32 %s1974_s27, 4  ;;  %s36_s28 = int_to_ptr.vmem [resolvable:$true] %s35_s28 }
   0x6   :  { %s1832_s29 = scalar_lea.vmem %s36_s28, 4096  ;;  %p1837_p1 = scmp.lt.s32.totalorder %s36_s28, %s36_s28 }
   0x7   :  { %p1833_p0 = scmp.ne.s32.totalorder %s36_s28, %s1832_s29  ;;  %p1838_p2 = scmp.lt.s32.totalorder %s1832_s29, %s1832_s29 }
   0x9   :  { %p1839_p3 = por %p1838_p2, %p1837_p1 }
   0xb   :  { %p1840_p4 = pnand %p1839_p3, %p1833_p0 }
   0xd   :  { %1843 = shalt.err (!%p1840_p4)
}
   0xe   :  { %s1975_s30 = smov 256   ;;  %s1976_s9 = smov 16  }
   0xf   :  { %41 = dma.hbm_to_vmem [thread:$0]  %s2350_s2, 4096, %s36_s28, [#allocation6], %s1975_s30, %s1975_s30, %s1976_s9  }
  0x10   :  { %s1977_s12 = smov [#allocation8]   ;;  %s1978_s14 = smov [#allocation2]  }
  0x11   :  { %s59_s13 = sshll.u32 %s1977_s12, 4  ;;  %s26_s15 = sshll.u32 %s1978_s14, 4  ;;  %s60_s13 = int_to_ptr.vmem [resolvable:$true] %s59_s13  ;;  %s27_s15 = int_to_ptr.vmem [resolvable:$true] %s26_s15 }
  0x12   :  { %s1852_s16 = scalar_lea.vmem %s60_s13, 2048  ;;  %p1857_p6 = scmp.lt.s32.totalorder %s60_s13, %s60_s13 }
  0x13   :  { %p1853_p5 = scmp.ne.s32.totalorder %s60_s13, %s1852_s16  ;;  %p1858_p7 = scmp.lt.s32.totalorder %s1852_s16, %s1852_s16 }
  0x15   :  { %p1859_p8 = por %p1858_p7, %p1857_p6 }
  0x17   :  { %p1860_p9 = pnand %p1859_p8, %p1853_p5 }
  0x19   :  { %1863 = shalt.err (!%p1860_p9)
}
  0x1a   :  { %s1979_s17 = smov 128   ;;  %s1980_s18 = smov 8  }
  0x1b   :  { %65 = dma.hbm_to_vmem [thread:$0]  %s2352_s4, 2048, %s60_s13, [#allocation9], %s1979_s17, %s1979_s17, %s1980_s18  }
  0x1c   :  { %s1872_s2 = scalar_lea.vmem %s27_s15, 256  ;;  %p1877_p11 = scmp.lt.s32.totalorder %s27_s15, %s27_s15 }
  0x1d   :  { %p1873_p10 = scmp.ne.s32.totalorder %s27_s15, %s1872_s2  ;;  %p1878_p12 = scmp.lt.s32.totalorder %s1872_s2, %s1872_s2 }
  0x1f   :  { %p1879_p13 = por %p1878_p12, %p1877_p11 }
  0x21   :  { %p1880_p0 = pnand %p1879_p13, %p1873_p10 }
  0x23   :  { %1883 = shalt.err (!%p1880_p0)
}
  0x24   :  { %29 = dma.hbm_to_vmem [thread:$0]  %s2349_s1, 256, %s27_s15, [#allocation3]  }
  0x25   :  { %s1981_s23 = smov [#allocation7]   ;;  %s1982_s25 = smov [#allocation10]  }
  0x26   :  { %s47_s24 = sshll.u32 %s1981_s23, 4  ;;  %s71_s26 = sshll.u32 %s1982_s25, 4  ;;  %s48_s24 = int_to_ptr.vmem [resolvable:$true] %s47_s24  ;;  %s72_s26 = int_to_ptr.vmem [resolvable:$true] %s71_s26 }
  0x27   :  { %s1892_s27 = scalar_lea.vmem %s48_s24, 2048  ;;  %p1897_p2 = scmp.lt.s32.totalorder %s48_s24, %s48_s24 }
  0x28   :  { %p1893_p1 = scmp.ne.s32.totalorder %s48_s24, %s1892_s27  ;;  %p1898_p3 = scmp.lt.s32.totalorder %s1892_s27, %s1892_s27 }
  0x2a   :  { %p1899_p4 = por %p1898_p3, %p1897_p2 }
  0x2c   :  { %p1900_p5 = pnand %p1899_p4, %p1893_p1 }
  0x2e   :  { %1903 = shalt.err (!%p1900_p5)
}
  0x2f   :  { %53 = dma.hbm_to_vmem [thread:$0]  %s2351_s3, 2048, %s48_s24, [#allocation6], %s1979_s17, %s1979_s17, %s1980_s18  }
  0x30   :  { %s1912_s1 = scalar_lea.vmem %s72_s26, 1024  ;;  %p1917_p7 = scmp.lt.s32.totalorder %s72_s26, %s72_s26 }
  0x31   :  { %p1913_p6 = scmp.ne.s32.totalorder %s72_s26, %s1912_s1  ;;  %p1918_p8 = scmp.lt.s32.totalorder %s1912_s1, %s1912_s1 }
  0x33   :  { %p1919_p9 = por %p1918_p8, %p1917_p7 }
  0x35   :  { %p1920_p10 = pnand %p1919_p9, %p1913_p6 }
  0x37   :  { %1923 = shalt.err (!%p1920_p10)
}
  0x38   :  { %77 = dma.hbm_to_vmem [thread:$0]  %s2353_s5, 1024, %s72_s26, [#allocation9], %s1979_s17, %s1979_s17, %s1980_s18  }
  0x39   :  { %s1983_s9 = smov [#allocation11]  }
  0x3a   :  { %s85_s10 = sshll.u32 %s1983_s9, 4  ;;  %s86_s10 = int_to_ptr.vmem [resolvable:$true] %s85_s10 }
  0x3b   :  { %s1932_s11 = scalar_lea.vmem %s86_s10, 2048  ;;  %p1937_p12 = scmp.lt.s32.totalorder %s86_s10, %s86_s10 }
  0x3c   :  { %p1933_p11 = scmp.ne.s32.totalorder %s86_s10, %s1932_s11  ;;  %p1938_p13 = scmp.lt.s32.totalorder %s1932_s11, %s1932_s11 }
  0x3e   :  { %p1939_p0 = por %p1938_p13, %p1937_p12 }
  0x40   :  { %p1940_p1 = pnand %p1939_p0, %p1933_p11 }
  0x42   :  { %1943 = shalt.err (!%p1940_p1)
}
  0x43   :  { %91 = dma.hbm_to_vmem [thread:$0]  %s2355_s7, 2048, %s86_s10, [#allocation12], %s1979_s17, %s1979_s17, %s1980_s18  }
  0x44   :  { %1964 = dma.done.wait [#allocation3], 256  }
  0x45   :  { %1965 = vsyncadd [#allocation3], 4294967040 }
  0x46   :  { %1966 = dma.done.wait [#allocation6], 6144  }
  0x47   :  { %1967 = vsyncadd [#allocation6], 4294961152 }
  0x48   :  { %1968 = dma.done.wait [#allocation9], 3072  }
  0x49   :  { %1969 = vsyncadd [#allocation9], 4294964224 }
  0x4a   :  { %1970 = dma.done.wait [#allocation12], 2048  }
  0x4b   :  { %1971 = vsyncadd [#allocation12], 4294965248  ;;  %v135_v0 = vld [vmem:[#allocation7 + $0x78] sm:$0xff]  ;;  %v134_v1 = vld [vmem:[#allocation7 + $0x70] sm:$0xff]  ;;  %vm1037_vm0 = vcmask 523264   ;;  %s1986_s28 = smov [#allocation13]  }
  0x4c   :  { %1488 = vmatprep.subr.mxu0 %v135_v0  ;;  %1532 = vmatprep.subr.mxu1 %v135_v0  ;;  %v133_v2 = vld [vmem:[#allocation7 + $0x68] sm:$0xff]  ;;  %v132_v3 = vld [vmem:[#allocation7 + $0x60] sm:$0xff]  ;;  %v2065_v4 = vld [vmem:[%s2348_s0] sm:$0xff]  ;;  %s1329_s1 = sshll.u32 %s1986_s28, 4  ;;  %s1330_s1 = int_to_ptr.vmem [resolvable:$true] %s1329_s1 }
  0x4d   :  { %1489 = vmatpush3.msra.mxu0 %v135_v0  ;;  %1533 = vmatpush3.msra.mxu1 %v135_v0  ;;  %v131_v5 = vld [vmem:[#allocation7 + $0x58] sm:$0xff]  ;;  %v130_v6 = vld [vmem:[#allocation7 + $0x50] sm:$0xff]  ;;  %v129_v7 = vld [vmem:[#allocation7 + $0x48] sm:$0xff]  ;;  %s1944_s11 = scalar_lea.vmem %s1330_s1, 1024  ;;  %p1949_p3 = scmp.lt.s32.totalorder %s1330_s1, %s1330_s1 }
  0x4e   :  { %1490 = vmatprep.subr.mxu0 %v134_v1  ;;  %1534 = vmatprep.subr.mxu1 %v134_v1  ;;  %v128_v8 = vld [vmem:[#allocation7 + $0x40] sm:$0xff]  ;;  %v127_v9 = vld [vmem:[#allocation7 + $0x38] sm:$0xff]  ;;  %v126_v10 = vld [vmem:[#allocation7 + $0x30] sm:$0xff]  ;;  %p1945_p2 = scmp.ne.s32.totalorder %s1330_s1, %s1944_s11  ;;  %p1950_p4 = scmp.lt.s32.totalorder %s1944_s11, %s1944_s11 }
  0x4f   :  { %1491 = vmatpush3.msra.mxu0 %v134_v1  ;;  %1535 = vmatpush3.msra.mxu1 %v134_v1  ;;  %v125_v11 = vld [vmem:[#allocation7 + $0x28] sm:$0xff]  ;;  %v124_v12 = vld [vmem:[#allocation7 + $0x20] sm:$0xff]  ;;  %v123_v13 = vld [vmem:[#allocation7 + $0x18] sm:$0xff] }
  0x50   :  { %1492 = vmatprep.subr.mxu0 %v133_v2  ;;  %1536 = vmatprep.subr.mxu1 %v133_v2  ;;  %v122_v14 = vld [vmem:[#allocation7 + $0x10] sm:$0xff]  ;;  %v121_v15 = vld [vmem:[#allocation7 + $0x8] sm:$0xff]  ;;  %v120_v16 = vld [vmem:[#allocation7] sm:$0xff]  ;;  %p1951_p5 = por %p1950_p4, %p1949_p3 }
  0x51   :  { %1493 = vmatpush3.msra.mxu0 %v133_v2  ;;  %1520 = vmatprep.mubr.f32.mxu0 %v2065_v4  ;;  %v113_v17 = vld [vmem:[%s2348_s0 + $0x8] sm:$0xff]  ;;  %v114_v18 = vld [vmem:[%s2348_s0 + $0x10] sm:$0xff]  ;;  %v115_v19 = vld [vmem:[%s2348_s0 + $0x18] sm:$0xff] }
  0x52   :  { %1494 = vmatprep.subr.mxu0 %v132_v3  ;;  %1537 = vmatpush3.msra.mxu1 %v133_v2  ;;  %v116_v20 = vld [vmem:[%s2348_s0 + $0x20] sm:$0xff]  ;;  %v117_v21 = vld [vmem:[%s2348_s0 + $0x28] sm:$0xff]  ;;  %v118_v22 = vld [vmem:[%s2348_s0 + $0x30] sm:$0xff]  ;;  %p1952_p6 = pnand %p1951_p5, %p1945_p2 }
  0x53   :  { %1495 = vmatpush3.msra.mxu0 %v132_v3  ;;  %1538 = vmatprep.subr.mxu1 %v132_v3  ;;  %v119_v23 = vld [vmem:[%s2348_s0 + $0x38] sm:$0xff]  ;;  %v433_v24 = vld [vmem:[#allocation5 + $0xf8] sm:$0xff]  ;;  %v432_v25 = vld [vmem:[#allocation5 + $0xf0] sm:$0xff] }
  0x54   :  { %1496 = vmatprep.subr.mxu0 %v131_v5  ;;  %1539 = vmatpush3.msra.mxu1 %v132_v3  ;;  %v431_v26 = vld [vmem:[#allocation5 + $0xe8] sm:$0xff]  ;;  %v430_v27 = vld [vmem:[#allocation5 + $0xe0] sm:$0xff]  ;;  %v429_v28 = vld [vmem:[#allocation5 + $0xd8] sm:$0xff] }
  0x55   :  { %1497 = vmatpush3.msra.mxu0 %v131_v5  ;;  %1540 = vmatprep.subr.mxu1 %v131_v5  ;;  %v428_v29 = vld [vmem:[#allocation5 + $0xd0] sm:$0xff]  ;;  %v427_v30 = vld [vmem:[#allocation5 + $0xc8] sm:$0xff]  ;;  %v426_v55 = vld [vmem:[#allocation5 + $0xc0] sm:$0xff] }
  0x56   :  { %1498 = vmatprep.subr.mxu0 %v130_v6  ;;  %1541 = vmatpush3.msra.mxu1 %v131_v5  ;;  %v425_v56 = vld [vmem:[#allocation5 + $0xb8] sm:$0xff]  ;;  %v424_v57 = vld [vmem:[#allocation5 + $0xb0] sm:$0xff]  ;;  %v423_v58 = vld [vmem:[#allocation5 + $0xa8] sm:$0xff] }
  0x57   :  { %1499 = vmatpush3.msra.mxu0 %v130_v6  ;;  %1542 = vmatprep.subr.mxu1 %v130_v6  ;;  %v422_v59 = vld [vmem:[#allocation5 + $0xa0] sm:$0xff]  ;;  %v421_v60 = vld [vmem:[#allocation5 + $0x98] sm:$0xff]  ;;  %v420_v61 = vld [vmem:[#allocation5 + $0x90] sm:$0xff] }
  0x58   :  { %1500 = vmatprep.subr.mxu0 %v129_v7  ;;  %1543 = vmatpush3.msra.mxu1 %v130_v6  ;;  %v419_v62 = vld [vmem:[#allocation5 + $0x88] sm:$0xff]  ;;  %v418_v63 = vld [vmem:[#allocation5 + $0x80] sm:$0xff]  ;;  %v417_v0 = vld [vmem:[#allocation5 + $0x78] sm:$0xff] }
  0x59   :  { %1501 = vmatpush3.msra.mxu0 %v129_v7  ;;  %1544 = vmatprep.subr.mxu1 %v129_v7  ;;  %v416_v1 = vld [vmem:[#allocation5 + $0x70] sm:$0xff]  ;;  %v415_v2 = vld [vmem:[#allocation5 + $0x68] sm:$0xff]  ;;  %v414_v3 = vld [vmem:[#allocation5 + $0x60] sm:$0xff] }
  0x5a   :  { %1502 = vmatprep.subr.mxu0 %v128_v8  ;;  %1545 = vmatpush3.msra.mxu1 %v129_v7  ;;  %v412_v5 = vld [vmem:[#allocation5 + $0x50] sm:$0xff]  ;;  %v411_v6 = vld [vmem:[#allocation5 + $0x48] sm:$0xff]  ;;  %v410_v7 = vld [vmem:[#allocation5 + $0x40] sm:$0xff] }
  0x5b   :  { %1503 = vmatpush3.msra.mxu0 %v128_v8  ;;  %1546 = vmatprep.subr.mxu1 %v128_v8 }
  0x5c   :  { %1504 = vmatprep.subr.mxu0 %v127_v9  ;;  %1547 = vmatpush3.msra.mxu1 %v128_v8  ;;  %v409_v8 = vld [vmem:[#allocation5 + $0x38] sm:$0xff] }
  0x5d   :  { %1505 = vmatpush3.msra.mxu0 %v127_v9  ;;  %1548 = vmatprep.subr.mxu1 %v127_v9 }
  0x5e   :  { %1506 = vmatprep.subr.mxu0 %v126_v10  ;;  %1549 = vmatpush3.msra.mxu1 %v127_v9  ;;  %v408_v9 = vld [vmem:[#allocation5 + $0x30] sm:$0xff] }
  0x5f   :  { %1507 = vmatpush3.msra.mxu0 %v126_v10  ;;  %1550 = vmatprep.subr.mxu1 %v126_v10 }
  0x60   :  { %1508 = vmatprep.subr.mxu0 %v125_v11  ;;  %1551 = vmatpush3.msra.mxu1 %v126_v10  ;;  %v407_v10 = vld [vmem:[#allocation5 + $0x28] sm:$0xff] }
  0x61   :  { %1509 = vmatpush3.msra.mxu0 %v125_v11  ;;  %1552 = vmatprep.subr.mxu1 %v125_v11 }
  0x62   :  { %1510 = vmatprep.subr.mxu0 %v124_v12  ;;  %1553 = vmatpush3.msra.mxu1 %v125_v11  ;;  %v406_v11 = vld [vmem:[#allocation5 + $0x20] sm:$0xff] }
  0x63   :  { %1511 = vmatpush3.msra.mxu0 %v124_v12  ;;  %1554 = vmatprep.subr.mxu1 %v124_v12 }
  0x64   :  { %1512 = vmatprep.subr.mxu0 %v123_v13  ;;  %1555 = vmatpush3.msra.mxu1 %v124_v12  ;;  %v405_v12 = vld [vmem:[#allocation5 + $0x18] sm:$0xff] }
  0x65   :  { %1513 = vmatpush3.msra.mxu0 %v123_v13  ;;  %1556 = vmatprep.subr.mxu1 %v123_v13 }
  0x66   :  { %1514 = vmatprep.subr.mxu0 %v122_v14  ;;  %1557 = vmatpush3.msra.mxu1 %v123_v13  ;;  %v404_v13 = vld [vmem:[#allocation5 + $0x10] sm:$0xff] }
  0x67   :  { %1515 = vmatpush3.msra.mxu0 %v122_v14  ;;  %1558 = vmatprep.subr.mxu1 %v122_v14 }
  0x68   :  { %1516 = vmatprep.subr.mxu0 %v121_v15  ;;  %1559 = vmatpush3.msra.mxu1 %v122_v14  ;;  %v403_v14 = vld [vmem:[#allocation5 + $0x8] sm:$0xff] }
  0x69   :  { %1517 = vmatpush3.msra.mxu0 %v121_v15  ;;  %1560 = vmatprep.subr.mxu1 %v121_v15 }
  0x6a   :  { %1518 = vmatprep.subr.mxu0 %v120_v16  ;;  %1561 = vmatpush3.msra.mxu1 %v121_v15  ;;  %v1984_v15 = vmov 0.0  }
  0x6b   :  { %1519 = vmatpush3.msra.mxu0 %v120_v16  ;;  %1562 = vmatprep.subr.mxu1 %v120_v16 }
  0x6c   :  { %1521 = vmatmul.mubr.f32.vlgmr.msra.gmra.mxu0 %v113_v17  ;;  %1563 = vmatpush3.msra.mxu1 %v120_v16  ;;  %v402_v16 = vld [vmem:[#allocation5] sm:$0xff] }
  0x6d   :  { %1523 = vmatprep.mubr.f32.mxu0 %v114_v18  ;;  %442 = vmatprep.subr.mxu0 %v433_v24 }
  0x6e   :  { %443 = vmatpush1.msra.mxu0 %v432_v25 }
  0x6f   :  { %444 = vmatprep.subr.mxu0 %v431_v26 }
  0x70   :  { %1524 = vmatmul.mubr.f32.gmra.mxu0 %v115_v19 }
  0x71   :  { %1526 = vmatprep.mubr.f32.mxu0 %v116_v20  ;;  %445 = vmatpush1.msra.mxu0 %v430_v27 }
  0x72   :  { %446 = vmatprep.subr.mxu0 %v429_v28 }
  0x73   :  { %447 = vmatpush1.msra.mxu0 %v428_v29 }
  0x74   :  { %1527 = vmatmul.mubr.f32.gmra.mxu0 %v117_v21  ;;  %448 = vmatprep.subr.mxu0 %v427_v30 }
  0x75   :  { %1529 = vmatprep.mubr.f32.mxu0 %v118_v22  ;;  %449 = vmatpush1.msra.mxu0 %v426_v55 }
  0x76   :  { %450 = vmatprep.subr.mxu0 %v425_v56 }
  0x77   :  { %451 = vmatpush1.msra.mxu0 %v424_v57 }
  0x78   :  { %1530 = vmatmul.mubr.f32.gmra.mxu0 %v119_v23  ;;  %452 = vmatprep.subr.mxu0 %v423_v58 }
  0x79   :  { %453 = vmatpush1.msra.mxu0 %v422_v59  ;;  %506 = vmatprep.mubr.f32.mxu0 %v1984_v15 }
  0x7a   :  { %454 = vmatprep.subr.mxu0 %v421_v60 }
  0x7b   :  { %455 = vmatpush1.msra.mxu0 %v420_v61 }
  0x7c   :  { %456 = vmatprep.subr.mxu0 %v419_v62 }
  0x7d   :  { %457 = vmatpush1.msra.mxu0 %v418_v63 }
  0x7e   :  { %458 = vmatprep.subr.mxu0 %v417_v0 }
  0x7f   :  { %459 = vmatpush1.msra.mxu0 %v416_v1 }
  0x80   :  { %460 = vmatprep.subr.mxu0 %v415_v2 }
  0x81   :  { %461 = vmatpush1.msra.mxu0 %v414_v3 }
 0x12c   :  { %v1522_v31 = vpop.f32.mrf.mxu0 }
 0x12d   :  { %v2089_v32 = vsub.f32 %v113_v17, %v1522_v31 }
 0x12e   :  { %v202_v33 = vpop.f32.mrf.mxu0 }
 0x12f   :  { %v2092_v34 = vsub.f32 %v2065_v4, %v202_v33  ;;  %v250_v38 = vmul.f32 %v2089_v32, %v2089_v32  ;;  %v413_v4 = vld [vmem:[#allocation5 + $0x58] sm:$0xff] }
 0x130   :  { %v1525_v35 = vpop.f32.mrf.mxu0  ;;  %462 = vmatprep.subr.mxu0 %v413_v4 }
 0x131   :  { %v2094_v36 = vsub.f32 %v115_v19, %v1525_v35  ;;  %v249_v37 = vmul.f32 %v2092_v34, %v2092_v34  ;;  %463 = vmatpush1.msra.mxu0 %v412_v5  ;;  %v2126_v35 = vld [vmem:[#allocation2] sm:$0xff] }
 0x132   :  { %v212_v39 = vpop.f32.mrf.mxu0  ;;  %464 = vmatprep.subr.mxu0 %v411_v6 }
 0x133   :  { %v2100_v40 = vsub.f32 %v114_v18, %v212_v39  ;;  %1564 = vmatprep.mubr.f32.mxu1 %v249_v37  ;;  %v252_v41 = vmul.f32 %v2094_v36, %v2094_v36  ;;  %465 = vmatpush1.msra.mxu0 %v410_v7 }
 0x134   :  { %v1528_v42 = vpop.f32.mrf.mxu0  ;;  %1565 = vmatmul.mubr.f32.vlgmr.msra.gmra.mxu1 %v250_v38  ;;  %466 = vmatprep.subr.mxu0 %v409_v8 }
 0x135   :  { %v251_v43 = vmul.f32 %v2100_v40, %v2100_v40  ;;  %v2106_v44 = vsub.f32 %v117_v21, %v1528_v42  ;;  %467 = vmatpush1.msra.mxu0 %v408_v9 }
 0x136   :  { %v222_v45 = vpop.f32.mrf.mxu0  ;;  %468 = vmatprep.subr.mxu0 %v407_v10  ;;  %v714_v10 = vld [vmem:[#allocation8 + $0x78] sm:$0xff] }
 0x137   :  { %v2108_v46 = vsub.f32 %v116_v20, %v222_v45  ;;  %1567 = vmatprep.mubr.f32.mxu1 %v251_v43  ;;  %v254_v47 = vmul.f32 %v2106_v44, %v2106_v44  ;;  %469 = vmatpush1.msra.mxu0 %v406_v11  ;;  %v711_v11 = vld [vmem:[#allocation8 + $0x60] sm:$0xff] }
 0x138   :  { %v1531_v48 = vpop.f32.mrf.mxu0  ;;  %1568 = vmatmul.mubr.f32.gmra.mxu1 %v252_v41  ;;  %470 = vmatprep.subr.mxu0 %v405_v12  ;;  %v710_v12 = vld [vmem:[#allocation8 + $0x58] sm:$0xff] }
 0x139   :  { %v253_v49 = vmul.f32 %v2108_v46, %v2108_v46  ;;  %v2114_v50 = vsub.f32 %v119_v23, %v1531_v48  ;;  %471 = vmatpush1.msra.mxu0 %v404_v13  ;;  %v378_v23 = vlaneseq  ;;  %1576 = vmatprep.subr.mxu1 %v714_v10  ;;  %v709_v13 = vld [vmem:[#allocation8 + $0x50] sm:$0xff] }
 0x13a   :  { %v232_v51 = vpop.f32.mrf.mxu0  ;;  %472 = vmatprep.subr.mxu0 %v403_v14  ;;  %1577 = vmatpush3.msra.mxu1 %v714_v10  ;;  %v708_v14 = vld [vmem:[#allocation8 + $0x48] sm:$0xff] }
 0x13b   :  { %v2116_v52 = vsub.f32 %v118_v22, %v232_v51  ;;  %1570 = vmatprep.mubr.f32.mxu1 %v253_v49  ;;  %v256_v53 = vmul.f32 %v2114_v50, %v2114_v50  ;;  %473 = vmatpush1.msra.mxu0 %v402_v16  ;;  %v2123_v28 = vshrl.u32 %v378_v23, 7  ;;  %v706_v16 = vld [vmem:[#allocation8 + $0x38] sm:$0xff]  ;;  %v699_v23 = vld [vmem:[#allocation8] sm:$0xff] }
 0x13c   :  { %1571 = vmatmul.mubr.f32.gmra.mxu1 %v254_v47  ;;  %1620 = vmatprep.subr.mxu0 %v714_v10 }
 0x13d   :  { %v255_v54 = vmul.f32 %v2116_v52, %v2116_v52  ;;  %v380_v31 = vsub.s32 0, %v2123_v28  ;;  %v392_v39 = vsub.s32 1, %v2123_v28 }
 0x13f   :  { %1573 = vmatprep.mubr.f32.mxu1 %v255_v54  ;;  %v381_v42 = vrot.slane %v2126_v35, %v380_v31  ;;  %v393_v49 = vrot.slane %v2126_v35, %v392_v39 }
 0x140   :  { %1574 = vmatmul.mubr.f32.gmra.mxu1 %v256_v53 }
 0x1f4   :  { %v1566_v17 = vpop.f32.mrf.mxu1 }
 0x1f5   :  { %v329_v18 = vadd.f32 1e-05, %v1566_v17  ;;  %v705_v17 = vld [vmem:[#allocation8 + $0x30] sm:$0xff] }
 0x1f6   :  { %v323_v19 = vpop.f32.mrf.mxu1 }
 0x1f7   :  { %1751 = vrsqrt.f32 %v329_v18  ;;  %v324_v20 = vadd.f32 1e-05, %v323_v19  ;;  %v704_v18 = vld [vmem:[#allocation8 + $0x28] sm:$0xff]  ;;  %v703_v19 = vld [vmem:[#allocation8 + $0x20] sm:$0xff] }
 0x1f8   :  { %v1569_v21 = vpop.f32.mrf.mxu1 }
 0x1f9   :  { %1753 = vrsqrt.f32 %v324_v20  ;;  %v339_v24 = vadd.f32 1e-05, %v1569_v21  ;;  %v702_v20 = vld [vmem:[#allocation8 + $0x18] sm:$0xff]  ;;  %v701_v21 = vld [vmem:[#allocation8 + $0x10] sm:$0xff] }
 0x1fa   :  { %v333_v22 = vpop.f32.mrf.mxu1 }
 0x1fb   :  { %v334_v25 = vadd.f32 1e-05, %v333_v22  ;;  %v700_v22 = vld [vmem:[#allocation8 + $0x8] sm:$0xff] }
 0x1fc   :  { %v1572_v26 = vpop.f32.mrf.mxu1 }
 0x1fd   :  { %1755 = vrsqrt.f32 %v334_v25  ;;  %v349_v33 = vadd.f32 1e-05, %v1572_v26  ;;  %v436_v25 = vsub.s32 2, %v2123_v28 }
 0x1fe   :  { %v343_v27 = vpop.f32.mrf.mxu1  ;;  %1757 = vrsqrt.f32 %v339_v24  ;;  %v111_v24 = vld [vmem:[#allocation2 + $0x8] sm:$0xff] }
 0x1ff   :  { %v344_v29 = vadd.f32 1e-05, %v343_v27  ;;  %v441_v26 = vrot.slane %v111_v24, %v436_v25 }
 0x200   :  { %v1575_v30 = vpop.f32.mrf.mxu1 }
 0x201   :  { %1759 = vrsqrt.f32 %v344_v29  ;;  %v359_v53 = vadd.f32 1e-05, %v1575_v30 }
 0x202   :  { %v353_v38 = vpop.f32.mrf.mxu1  ;;  %1761 = vrsqrt.f32 %v349_v33 }
 0x203   :  { %v354_v45 = vadd.f32 1e-05, %v353_v38 }
 0x204   :  { %v1752_v37 = vpop.eup %1751 }
 0x205   :  { %v371_v47 = vmul.f32 %v1752_v37, %v2089_v32  ;;  %1763 = vrsqrt.f32 %v354_v45 }
 0x206   :  { %v1754_v41 = vpop.eup %1753  ;;  %1765 = vrsqrt.f32 %v359_v53 }
 0x207   :  { %v370_v43 = vmul.f32 %v1754_v41, %v2092_v34  ;;  %v383_v55 = vmul.f32 %v381_v42, %v371_v47 }
 0x209   :  { %v382_v48 = vmul.f32 %v381_v42, %v370_v43  ;;  %v395_v34 = vadd.f32 %v393_v49, %v383_v55 }
 0x20a   :  { %v1756_v51 = vpop.eup %1755 }
 0x20b   :  { %v394_v54 = vadd.f32 %v393_v49, %v382_v48  ;;  %v372_v56 = vmul.f32 %v1756_v51, %v2100_v40  ;;  %v1758_v57 = vpop.eup %1757 }
 0x20c   :  { %v373_v59 = vmul.f32 %v1758_v57, %v2094_v36 }
 0x20d   :  { %507 = vmatmul.mubr.f32.vlgmr.msra.gmra.mxu0 %v394_v54  ;;  %v384_v58 = vmul.f32 %v381_v42, %v372_v56 }
 0x20e   :  { %512 = vmatprep.mubr.f32.mxu0 %v1984_v15  ;;  %v1760_v32 = vpop.eup %1759  ;;  %v385_v61 = vmul.f32 %v381_v42, %v373_v59  ;;  %1621 = vmatpush3.msra.mxu0 %v714_v10 }
 0x20f   :  { %v396_v60 = vadd.f32 %v393_v49, %v384_v58  ;;  %v374_v62 = vmul.f32 %v1760_v32, %v2108_v46  ;;  %v1762_v63 = vpop.eup %1761 }
 0x210   :  { %v397_v40 = vadd.f32 %v393_v49, %v385_v61  ;;  %v375_v1 = vmul.f32 %v1762_v63, %v2106_v44 }
 0x211   :  { %513 = vmatmul.mubr.f32.gmra.mxu0 %v395_v34  ;;  %v386_v0 = vmul.f32 %v381_v42, %v374_v62 }
 0x212   :  { %518 = vmatprep.mubr.f32.mxu0 %v1984_v15  ;;  %v1764_v2 = vpop.eup %1763  ;;  %v387_v3 = vmul.f32 %v381_v42, %v375_v1 }
 0x213   :  { %v398_v36 = vadd.f32 %v393_v49, %v386_v0  ;;  %v376_v4 = vmul.f32 %v1764_v2, %v2116_v52  ;;  %v1766_v5 = vpop.eup %1765  ;;  %v713_v52 = vld [vmem:[#allocation8 + $0x70] sm:$0xff] }
 0x214   :  { %v399_v46 = vadd.f32 %v393_v49, %v387_v3  ;;  %v377_v7 = vmul.f32 %v1766_v5, %v2114_v50  ;;  %1578 = vmatprep.subr.mxu1 %v713_v52  ;;  %1622 = vmatprep.subr.mxu0 %v713_v52  ;;  %v712_v50 = vld [vmem:[#allocation8 + $0x68] sm:$0xff] }
 0x215   :  { %519 = vmatmul.mubr.f32.gmra.mxu0 %v396_v60  ;;  %v388_v6 = vmul.f32 %v381_v42, %v376_v4  ;;  %1579 = vmatpush3.msra.mxu1 %v713_v52 }
 0x216   :  { %524 = vmatprep.mubr.f32.mxu0 %v1984_v15  ;;  %v389_v8 = vmul.f32 %v381_v42, %v377_v7  ;;  %1623 = vmatpush3.msra.mxu0 %v713_v52 }
 0x217   :  { %v400_v44 = vadd.f32 %v393_v49, %v388_v6  ;;  %1580 = vmatprep.subr.mxu1 %v712_v50  ;;  %1624 = vmatprep.subr.mxu0 %v712_v50 }
 0x218   :  { %v401_v9 = vadd.f32 %v393_v49, %v389_v8  ;;  %1581 = vmatpush3.msra.mxu1 %v712_v50  ;;  %1625 = vmatpush3.msra.mxu0 %v712_v50 }
 0x219   :  { %525 = vmatmul.mubr.f32.gmra.mxu0 %v397_v40  ;;  %1582 = vmatprep.subr.mxu1 %v711_v11 }
 0x21a   :  { %530 = vmatprep.mubr.f32.mxu0 %v1984_v15  ;;  %1626 = vmatprep.subr.mxu0 %v711_v11 }
 0x21b   :  { %1583 = vmatpush3.msra.mxu1 %v711_v11  ;;  %1627 = vmatpush3.msra.mxu0 %v711_v11 }
 0x21c   :  { %1584 = vmatprep.subr.mxu1 %v710_v12  ;;  %1628 = vmatprep.subr.mxu0 %v710_v12 }
 0x21d   :  { %531 = vmatmul.mubr.f32.gmra.mxu0 %v398_v36  ;;  %1585 = vmatpush3.msra.mxu1 %v710_v12 }
 0x21e   :  { %536 = vmatprep.mubr.f32.mxu0 %v1984_v15  ;;  %1629 = vmatpush3.msra.mxu0 %v710_v12 }
 0x21f   :  { %1586 = vmatprep.subr.mxu1 %v709_v13  ;;  %1630 = vmatprep.subr.mxu0 %v709_v13 }
 0x220   :  { %1587 = vmatpush3.msra.mxu1 %v709_v13  ;;  %1631 = vmatpush3.msra.mxu0 %v709_v13 }
 0x221   :  { %537 = vmatmul.mubr.f32.gmra.mxu0 %v399_v46  ;;  %1588 = vmatprep.subr.mxu1 %v708_v14 }
 0x222   :  { %542 = vmatprep.mubr.f32.mxu0 %v1984_v15  ;;  %1632 = vmatprep.subr.mxu0 %v708_v14 }
 0x223   :  { %1589 = vmatpush3.msra.mxu1 %v708_v14  ;;  %1633 = vmatpush3.msra.mxu0 %v708_v14 }
 0x225   :  { %543 = vmatmul.mubr.f32.gmra.mxu0 %v400_v44 }
 0x226   :  { %548 = vmatprep.mubr.f32.mxu0 %v1984_v15  ;;  %v707_v15 = vld [vmem:[#allocation8 + $0x40] sm:$0xff] }
 0x227   :  { %1590 = vmatprep.subr.mxu1 %v707_v15  ;;  %1634 = vmatprep.subr.mxu0 %v707_v15 }
 0x228   :  { %1591 = vmatpush3.msra.mxu1 %v707_v15  ;;  %1635 = vmatpush3.msra.mxu0 %v707_v15 }
 0x229   :  { %549 = vmatmul.mubr.f32.gmra.mxu0 %v401_v9  ;;  %1592 = vmatprep.subr.mxu1 %v706_v16 }
 0x22a   :  { %1636 = vmatprep.subr.mxu0 %v706_v16  ;;  %1593 = vmatpush3.msra.mxu1 %v706_v16 }
 0x22b   :  { %1637 = vmatpush3.msra.mxu0 %v706_v16  ;;  %1594 = vmatprep.subr.mxu1 %v705_v17 }
 0x22c   :  { %1638 = vmatprep.subr.mxu0 %v705_v17  ;;  %1595 = vmatpush3.msra.mxu1 %v705_v17 }
 0x22d   :  { %1639 = vmatpush3.msra.mxu0 %v705_v17  ;;  %1596 = vmatprep.subr.mxu1 %v704_v18 }
 0x22e   :  { %1640 = vmatprep.subr.mxu0 %v704_v18  ;;  %1597 = vmatpush3.msra.mxu1 %v704_v18 }
 0x22f   :  { %1641 = vmatpush3.msra.mxu0 %v704_v18  ;;  %1598 = vmatprep.subr.mxu1 %v703_v19 }
 0x230   :  { %1642 = vmatprep.subr.mxu0 %v703_v19  ;;  %1599 = vmatpush3.msra.mxu1 %v703_v19 }
 0x231   :  { %1643 = vmatpush3.msra.mxu0 %v703_v19  ;;  %1600 = vmatprep.subr.mxu1 %v702_v20 }
 0x232   :  { %1644 = vmatprep.subr.mxu0 %v702_v20  ;;  %1601 = vmatpush3.msra.mxu1 %v702_v20 }
 0x233   :  { %1645 = vmatpush3.msra.mxu0 %v702_v20  ;;  %1602 = vmatprep.subr.mxu1 %v701_v21 }
 0x234   :  { %1646 = vmatprep.subr.mxu0 %v701_v21  ;;  %1603 = vmatpush3.msra.mxu1 %v701_v21 }
 0x235   :  { %1647 = vmatpush3.msra.mxu0 %v701_v21  ;;  %1604 = vmatprep.subr.mxu1 %v700_v22 }
 0x236   :  { %1648 = vmatprep.subr.mxu0 %v700_v22  ;;  %1605 = vmatpush3.msra.mxu1 %v700_v22 }
 0x237   :  { %1649 = vmatpush3.msra.mxu0 %v700_v22  ;;  %1606 = vmatprep.subr.mxu1 %v699_v23 }
 0x238   :  { %1650 = vmatprep.subr.mxu0 %v699_v23  ;;  %1607 = vmatpush3.msra.mxu1 %v699_v23 }
 0x239   :  { %1651 = vmatpush3.msra.mxu0 %v699_v23 }
 0x2cd   :  { %v2149_v27 = vpop.f32.mrf.mxu0 }
 0x2cf   :  { %v510_v29 = vpop.f32.mrf.mxu0 }
 0x2d0   :  { %v511_v30 = vadd.f32 %v510_v29, %v441_v26 }
 0x2d1   :  { %v2151_v31 = vpop.f32.mrf.mxu0 }
 0x2d2   :  { %v572_v33 = vmul.f32 %v511_v30, %v511_v30  ;;  %v556_v18 = vmul.f32 0.5, %v511_v30 }
 0x2d3   :  { %v516_v37 = vpop.f32.mrf.mxu0 }
 0x2d4   :  { %v588_v38 = vmul.f32 %v572_v33, %v511_v30  ;;  %v517_v39 = vadd.f32 %v516_v37, %v441_v26 }
 0x2d5   :  { %v2153_v41 = vpop.f32.mrf.mxu0 }
 0x2d6   :  { %v604_v42 = vmul.f32 0.044715, %v588_v38  ;;  %v574_v43 = vmul.f32 %v517_v39, %v517_v39  ;;  %v558_v38 = vmul.f32 0.5, %v517_v39 }
 0x2d7   :  { %v522_v45 = vpop.f32.mrf.mxu0 }
 0x2d8   :  { %v620_v47 = vadd.f32 %v604_v42, %v511_v30  ;;  %v2155_v48 = vadd.f32 %v522_v45, %v441_v26  ;;  %v590_v49 = vmul.f32 %v574_v43, %v517_v39 }
 0x2d9   :  { %v2157_v51 = vpop.f32.mrf.mxu0 }
 0x2da   :  { %v636_v53 = vmul.f32 0.7978846, %v620_v47  ;;  %v576_v54 = vmul.f32 %v2155_v48, %v2155_v48  ;;  %v606_v55 = vmul.f32 0.044715, %v590_v49 }
 0x2db   :  { %v528_v56 = vpop.f32.mrf.mxu0 }
 0x2dc   :  { %v592_v57 = vmul.f32 %v576_v54, %v2155_v48  ;;  %v2162_v34 = vadd.f32 %v528_v56, %v441_v26  ;;  %1767 = vtanh.f32 %v636_v53  ;;  %v622_v58 = vadd.f32 %v606_v55, %v517_v39 }
 0x2dd   :  { %v2164_v59 = vpop.f32.mrf.mxu0  ;;  %v560_v54 = vmul.f32 0.5, %v2155_v48 }
 0x2de   :  { %v608_v32 = vmul.f32 0.044715, %v592_v57  ;;  %v578_v60 = vmul.f32 %v2162_v34, %v2162_v34  ;;  %v638_v61 = vmul.f32 0.7978846, %v622_v58  ;;  %v562_v39 = vmul.f32 0.5, %v2162_v34 }
 0x2df   :  { %v534_v62 = vpop.f32.mrf.mxu0 }
 0x2e0   :  { %v624_v63 = vadd.f32 %v608_v32, %v2155_v48  ;;  %v594_v40 = vmul.f32 %v578_v60, %v2162_v34  ;;  %v535_v0 = vadd.f32 %v534_v62, %v441_v26  ;;  %1769 = vtanh.f32 %v638_v61 }
 0x2e1   :  { %v2170_v1 = vpop.f32.mrf.mxu0 }
 0x2e2   :  { %v640_v2 = vmul.f32 0.7978846, %v624_v63  ;;  %v610_v36 = vmul.f32 0.044715, %v594_v40  ;;  %v580_v3 = vmul.f32 %v535_v0, %v535_v0  ;;  %v564_v62 = vmul.f32 0.5, %v535_v0 }
 0x2e3   :  { %v540_v4 = vpop.f32.mrf.mxu0 }
 0x2e4   :  { %v626_v5 = vadd.f32 %v610_v36, %v2162_v34  ;;  %v596_v46 = vmul.f32 %v580_v3, %v535_v0  ;;  %v541_v6 = vadd.f32 %v540_v4, %v441_v26  ;;  %1771 = vtanh.f32 %v640_v2 }
 0x2e5   :  { %v2173_v7 = vpop.f32.mrf.mxu0 }
 0x2e6   :  { %v642_v44 = vmul.f32 0.7978846, %v626_v5  ;;  %v612_v8 = vmul.f32 0.044715, %v596_v46  ;;  %v582_v9 = vmul.f32 %v541_v6, %v541_v6  ;;  %v566_v48 = vmul.f32 0.5, %v541_v6 }
 0x2e7   :  { %v546_v10 = vpop.f32.mrf.mxu0 }
 0x2e8   :  { %v628_v52 = vadd.f32 %v612_v8, %v535_v0  ;;  %v598_v50 = vmul.f32 %v582_v9, %v541_v6  ;;  %v547_v11 = vadd.f32 %v546_v10, %v441_v26  ;;  %1773 = vtanh.f32 %v642_v44 }
 0x2e9   :  { %v1768_v12 = vpop.eup %1767  ;;  %v2175_v13 = vpop.f32.mrf.mxu0 }
 0x2ea   :  { %v644_v14 = vmul.f32 0.7978846, %v628_v52  ;;  %v614_v15 = vmul.f32 0.044715, %v598_v50  ;;  %v584_v16 = vmul.f32 %v547_v11, %v547_v11  ;;  %v668_v19 = vadd.f32 1.0, %v1768_v12 }
 0x2eb   :  { %v552_v17 = vpop.f32.mrf.mxu0  ;;  %v568_v5 = vmul.f32 0.5, %v547_v11 }
 0x2ec   :  { %v630_v20 = vadd.f32 %v614_v15, %v541_v6  ;;  %v600_v21 = vmul.f32 %v584_v16, %v547_v11  ;;  %v553_v22 = vadd.f32 %v552_v17, %v441_v26  ;;  %1775 = vtanh.f32 %v644_v14 }
 0x2ed   :  { %v684_v23 = vmul.f32 %v668_v19, %v556_v18  ;;  %v1770_v24 = vpop.eup %1769 }
 0x2ee   :  { %v646_v29 = vmul.f32 0.7978846, %v630_v20  ;;  %v616_v33 = vmul.f32 0.044715, %v600_v21  ;;  %v586_v37 = vmul.f32 %v553_v22, %v553_v22  ;;  %v670_v42 = vadd.f32 1.0, %v1770_v24 }
 0x2ef   :  { %1608 = vmatprep.mubr.f32.mxu1 %v684_v23  ;;  %v570_v34 = vmul.f32 0.5, %v553_v22 }
 0x2f0   :  { %v632_v43 = vadd.f32 %v616_v33, %v547_v11  ;;  %v602_v45 = vmul.f32 %v586_v37, %v553_v22  ;;  %1777 = vtanh.f32 %v646_v29  ;;  %v686_v47 = vmul.f32 %v670_v42, %v558_v38 }
 0x2f1   :  { %v1772_v49 = vpop.eup %1771 }
 0x2f2   :  { %v648_v53 = vmul.f32 0.7978846, %v632_v43  ;;  %v618_v30 = vmul.f32 0.044715, %v602_v45  ;;  %1609 = vmatmul.mubr.f32.vlgmr.msra.gmra.mxu1 %v686_v47  ;;  %v672_v26 = vadd.f32 1.0, %v1772_v49  ;;  %v989_v49 = vld [vmem:[%s2354_s6] sm:$0xff] }
 0x2f4   :  { %v634_v55 = vadd.f32 %v618_v30, %v553_v22  ;;  %1779 = vtanh.f32 %v648_v53  ;;  %v688_v56 = vmul.f32 %v672_v26, %v560_v54  ;;  %v991_v53 = vld [vmem:[%s2354_s6 + $0x10] sm:$0xff]  ;;  %v1985_v30 = vmov 0   ;;  %v990_v54 = vld [vmem:[%s2354_s6 + $0x8] sm:$0xff]  ;;  %v992_v26 = vld [vmem:[%s2354_s6 + $0x18] sm:$0xff] }
 0x2f5   :  { %v1774_v57 = vpop.eup %1773  ;;  %1749 = vset.pattern.permute.xlu0 %v1985_v30  ;;  %1750 = vset.pattern.permute.xlu1 %v1985_v30 }
 0x2f6   :  { %v650_v58 = vmul.f32 0.7978846, %v634_v55  ;;  %1611 = vmatprep.mubr.f32.mxu1 %v688_v56  ;;  %v674_v32 = vadd.f32 1.0, %v1774_v57  ;;  %999 = vperm.xlu0 %1749, %v989_v49   ;;  %v993_v55 = vld [vmem:[%s2354_s6 + $0x20] sm:$0xff]  ;;  %v995_v57 = vld [vmem:[%s2354_s6 + $0x30] sm:$0xff] }
 0x2f7   :  { %1009 = vperm.xlu1 %1750, %v991_v53  }
 0x2f8   :  { %1781 = vtanh.f32 %v650_v58  ;;  %v690_v61 = vmul.f32 %v674_v32, %v562_v39  ;;  %v996_v58 = vld [vmem:[%s2354_s6 + $0x38] sm:$0xff] }
 0x2f9   :  { %v1776_v60 = vpop.eup %1775 }
 0x2fa   :  { %v676_v63 = vadd.f32 1.0, %v1776_v60  ;;  %1612 = vmatmul.mubr.f32.gmra.mxu1 %v690_v61  ;;  %1004 = vperm.xlu0 %1749, %v990_v54  }
 0x2fb   :  { %1014 = vperm.xlu1 %1750, %v992_v26  }
 0x2fc   :  { %v692_v40 = vmul.f32 %v676_v63, %v564_v62 }
 0x2fd   :  { %v1778_v2 = vpop.eup %1777 }
 0x2fe   :  { %1614 = vmatprep.mubr.f32.mxu1 %v692_v40  ;;  %v678_v36 = vadd.f32 1.0, %v1778_v2  ;;  %1019 = vperm.xlu0 %1749, %v993_v55  }
 0x300   :  { %v694_v3 = vmul.f32 %v678_v36, %v566_v48 }
 0x301   :  { %v1780_v4 = vpop.eup %1779 }
 0x302   :  { %1615 = vmatmul.mubr.f32.gmra.mxu1 %v694_v3  ;;  %v680_v46 = vadd.f32 1.0, %v1780_v4  ;;  %1029 = vperm.xlu0 %1749, %v995_v57  }
 0x304   :  { %v696_v44 = vmul.f32 %v680_v46, %v568_v5 }
 0x305   :  { %v1782_v8 = vpop.eup %1781 }
 0x306   :  { %1617 = vmatprep.mubr.f32.mxu1 %v696_v44  ;;  %v682_v9 = vadd.f32 1.0, %v1782_v8 }
 0x308   :  { %v698_v10 = vmul.f32 %v682_v9, %v570_v34  ;;  %v959_v34 = vsub.s32 3, %v2123_v28 }
 0x30a   :  { %1618 = vmatmul.mubr.f32.gmra.mxu1 %v698_v10 }
 0x3b2   :  { %v1610_v0 = vpop.f32.mrf.mxu1 }
 0x3b3   :  { %v2179_v52 = vsub.f32 %v686_v47, %v1610_v0  ;;  %v981_v47 = vld [vmem:[#allocation10] sm:$0xff]  ;;  %v971_v0 = vsub.s32 4, %v2123_v28 }
 0x3b4   :  { %v781_v50 = vpop.f32.mrf.mxu1  ;;  %1680 = vmatprep.mubr.msk.f32.mxu1 %vm1037_vm0, %v981_v47 }
 0x3b5   :  { %v2181_v12 = vsub.f32 %v684_v23, %v781_v50  ;;  %v829_v11 = vmul.f32 %v2179_v52, %v2179_v52 }
 0x3b7   :  { %v828_v6 = vmul.f32 %v2181_v12, %v2181_v12 }
 0x3b9   :  { %1652 = vmatprep.mubr.f32.mxu0 %v828_v6 }
 0x3ba   :  { %v1613_v14 = vpop.f32.mrf.mxu1  ;;  %1653 = vmatmul.mubr.f32.vlgmr.msra.gmra.mxu0 %v829_v11 }
 0x3bb   :  { %v2187_v15 = vsub.f32 %v690_v61, %v1613_v14  ;;  %v960_v14 = vrot.slane %v2126_v35, %v959_v34  ;;  %v1188_v34 = vld [vmem:[#allocation11 + $0x28] sm:$0xff] }
 0x3bc   :  { %v791_v16 = vpop.f32.mrf.mxu1 }
 0x3bd   :  { %v2189_v17 = vsub.f32 %v688_v56, %v791_v16  ;;  %v831_v19 = vmul.f32 %v2187_v15, %v2187_v15  ;;  %v994_v56 = vld [vmem:[%s2354_s6 + $0x28] sm:$0xff] }
 0x3be   :  { %1024 = vperm.xlu1 %1750, %v994_v56  }
 0x3bf   :  { %v830_v18 = vmul.f32 %v2189_v17, %v2189_v17 }
 0x3c1   :  { %1655 = vmatprep.mubr.f32.mxu0 %v830_v18 }
 0x3c2   :  { %v1616_v20 = vpop.f32.mrf.mxu1  ;;  %1656 = vmatmul.mubr.f32.gmra.mxu0 %v831_v19  ;;  %1034 = vperm.xlu1 %1750, %v996_v58  }
 0x3c3   :  { %v2195_v21 = vsub.f32 %v694_v3, %v1616_v20  ;;  %v972_v20 = vrot.slane %v2126_v35, %v971_v0  ;;  %v1185_v0 = vld [vmem:[#allocation11 + $0x10] sm:$0xff] }
 0x3c4   :  { %v801_v22 = vpop.f32.mrf.mxu1 }
 0x3c5   :  { %v2197_v23 = vsub.f32 %v692_v40, %v801_v22  ;;  %v833_v29 = vmul.f32 %v2195_v21, %v2195_v21 }
 0x3c7   :  { %v832_v24 = vmul.f32 %v2197_v23, %v2197_v23 }
 0x3c9   :  { %1658 = vmatprep.mubr.f32.mxu0 %v832_v24 }
 0x3ca   :  { %v1619_v33 = vpop.f32.mrf.mxu1  ;;  %1659 = vmatmul.mubr.f32.gmra.mxu0 %v833_v29 }
 0x3cb   :  { %v827_v37 = vsub.f32 %v698_v10, %v1619_v33 }
 0x3cc   :  { %v811_v38 = vpop.f32.mrf.mxu1 }
 0x3cd   :  { %v2203_v42 = vsub.f32 %v696_v44, %v811_v38  ;;  %v835_v45 = vmul.f32 %v827_v37, %v827_v37 }
 0x3cf   :  { %v834_v43 = vmul.f32 %v2203_v42, %v2203_v42 }
 0x3d1   :  { %1661 = vmatprep.mubr.f32.mxu0 %v834_v43 }
 0x3d2   :  { %1662 = vmatmul.mubr.f32.gmra.mxu0 %v835_v45 }
 0x47a   :  { %v1654_v39 = vpop.f32.mrf.mxu0 }
 0x47b   :  { %v908_v44 = vadd.f32 1e-05, %v1654_v39  ;;  %v982_v39 = vld [vmem:[#allocation10 + $0x8] sm:$0xff] }
 0x47c   :  { %v902_v32 = vpop.f32.mrf.mxu0 }
 0x47d   :  { %v903_v8 = vadd.f32 1e-05, %v902_v32  ;;  %v1198_v32 = vld [vmem:[#allocation11 + $0x78] sm:$0xff] }
 0x482   :  { %v1657_v60 = vpop.f32.mrf.mxu0 }
 0x483   :  { %v918_v48 = vadd.f32 1e-05, %v1657_v60  ;;  %v983_v60 = vld [vmem:[#allocation10 + $0x10] sm:$0xff] }
 0x484   :  { %v912_v61 = vpop.f32.mrf.mxu0 }
 0x485   :  { %v913_v5 = vadd.f32 1e-05, %v912_v61  ;;  %v984_v61 = vld [vmem:[#allocation10 + $0x18] sm:$0xff] }
 0x48a   :  { %v1660_v62 = vpop.f32.mrf.mxu0 }
 0x48b   :  { %v928_v40 = vadd.f32 1e-05, %v1660_v62  ;;  %v1196_v62 = vld [vmem:[#allocation11 + $0x68] sm:$0xff] }
 0x48c   :  { %v922_v63 = vpop.f32.mrf.mxu0 }
 0x48d   :  { %v923_v2 = vadd.f32 1e-05, %v922_v63  ;;  %1783 = vrsqrt.f32 %v928_v40  ;;  %v985_v63 = vld [vmem:[#allocation10 + $0x20] sm:$0xff] }
 0x48e   :  { %v1195_v40 = vld [vmem:[#allocation11 + $0x60] sm:$0xff] }
 0x48f   :  { %1785 = vrsqrt.f32 %v923_v2  ;;  %v986_v2 = vld [vmem:[#allocation10 + $0x28] sm:$0xff] }
 0x492   :  { %v1663_v36 = vpop.f32.mrf.mxu0 }
 0x493   :  { %v938_v3 = vadd.f32 1e-05, %v1663_v36  ;;  %v987_v36 = vld [vmem:[#allocation10 + $0x30] sm:$0xff] }
 0x494   :  { %v932_v4 = vpop.f32.mrf.mxu0 }
 0x495   :  { %1787 = vrsqrt.f32 %v938_v3  ;;  %v933_v46 = vadd.f32 1e-05, %v932_v4  ;;  %v1193_v3 = vld [vmem:[#allocation11 + $0x50] sm:$0xff]  ;;  %v988_v4 = vld [vmem:[#allocation10 + $0x38] sm:$0xff] }
 0x496   :  { %1789 = vrsqrt.f32 %v918_v48  ;;  %v1194_v48 = vld [vmem:[#allocation11 + $0x58] sm:$0xff] }
 0x497   :  { %1791 = vrsqrt.f32 %v933_v46  ;;  %v1191_v46 = vld [vmem:[#allocation11 + $0x40] sm:$0xff] }
 0x498   :  { %1793 = vrsqrt.f32 %v913_v5  ;;  %v1192_v5 = vld [vmem:[#allocation11 + $0x48] sm:$0xff] }
 0x499   :  { %1795 = vrsqrt.f32 %v908_v44  ;;  %v1190_v44 = vld [vmem:[#allocation11 + $0x38] sm:$0xff] }
 0x49a   :  { %1797 = vrsqrt.f32 %v903_v8  ;;  %v1784_v9 = vpop.eup %1783  ;;  %v1189_v8 = vld [vmem:[#allocation11 + $0x30] sm:$0xff] }
 0x49b   :  { %v954_v16 = vmul.f32 %v1784_v9, %v2195_v21  ;;  %v1187_v9 = vld [vmem:[#allocation11 + $0x20] sm:$0xff] }
 0x49c   :  { %v1786_v10 = vpop.eup %1785 }
 0x49d   :  { %v953_v24 = vmul.f32 %v1786_v10, %v2197_v23  ;;  %v966_v43 = vmul.f32 %v960_v14, %v954_v16  ;;  %v1186_v10 = vld [vmem:[#allocation11 + $0x18] sm:$0xff] }
 0x49f   :  { %v965_v49 = vmul.f32 %v960_v14, %v953_v24  ;;  %v978_v30 = vadd.f32 %v972_v20, %v966_v43 }
 0x4a1   :  { %v977_v23 = vadd.f32 %v972_v20, %v965_v49 }
 0x4a2   :  { %v1788_v50 = vpop.eup %1787 }
 0x4a3   :  { %v1790_v6 = vpop.eup %1789  ;;  %v956_v11 = vmul.f32 %v1788_v50, %v827_v37  ;;  %v1184_v50 = vld [vmem:[#allocation11 + $0x8] sm:$0xff] }
 0x4a4   :  { %v1792_v18 = vpop.eup %1791  ;;  %v952_v45 = vmul.f32 %v1790_v6, %v2187_v15  ;;  %v1183_v6 = vld [vmem:[#allocation11] sm:$0xff] }
 0x4a5   :  { %v968_v19 = vmul.f32 %v960_v14, %v956_v11  ;;  %v955_v22 = vmul.f32 %v1792_v18, %v2203_v42  ;;  %v1794_v29 = vpop.eup %1793  ;;  %v437_v11 = vrot.slane %v2126_v35, %v436_v25 }
 0x4a6   :  { %v1796_v47 = vpop.eup %1795  ;;  %v951_v21 = vmul.f32 %v1794_v29, %v2189_v17  ;;  %v964_v54 = vmul.f32 %v960_v14, %v952_v45 }
 0x4a7   :  { %v980_v33 = vadd.f32 %v972_v20, %v968_v19  ;;  %v967_v38 = vmul.f32 %v960_v14, %v955_v22  ;;  %v1798_v53 = vpop.eup %1797  ;;  %v950_v42 = vmul.f32 %v1796_v47, %v2179_v52  ;;  %v2257_v16 = vadd.f32 %v2151_v31, %v437_v11 }
 0x4a8   :  { %v963_v26 = vmul.f32 %v960_v14, %v951_v21  ;;  %v949_v55 = vmul.f32 %v1798_v53, %v2181_v12  ;;  %v976_v15 = vadd.f32 %v972_v20, %v964_v54  ;;  %v1197_v12 = vld [vmem:[#allocation11 + $0x70] sm:$0xff]  ;;  %v2262_v19 = vadd.f32 %v2153_v41, %v437_v11 }
 0x4a9   :  { %1664 = vmatprep.subr.mxu1 %v980_v33  ;;  %v979_v37 = vadd.f32 %v972_v20, %v967_v38  ;;  %v962_v56 = vmul.f32 %v960_v14, %v950_v42  ;;  %v2267_v22 = vadd.f32 %v2157_v51, %v437_v11  ;;  %v2279_v24 = vadd.f32 %v2170_v1, %v437_v11 }
 0x4aa   :  { %1665 = vmatpush3.msra.mxu1 %v980_v33  ;;  %v975_v17 = vadd.f32 %v972_v20, %v963_v26  ;;  %v961_v57 = vmul.f32 %v960_v14, %v949_v55  ;;  %v2254_v14 = vadd.f32 %v2149_v27, %v437_v11  ;;  %v575_v25 = vmul.f32 %v2262_v19, %v2262_v19 }
 0x4ab   :  { %1666 = vmatprep.subr.mxu1 %v979_v37  ;;  %v974_v58 = vadd.f32 %v972_v20, %v962_v56  ;;  %v2273_v27 = vadd.f32 %v2164_v59, %v437_v11  ;;  %v577_v41 = vmul.f32 %v2267_v22, %v2267_v22  ;;  %v2285_v38 = vadd.f32 %v2173_v7, %v437_v11 }
 0x4ac   :  { %1667 = vmatpush3.msra.mxu1 %v979_v37  ;;  %v973_v52 = vadd.f32 %v972_v20, %v961_v57  ;;  %v571_v18 = vmul.f32 %v2254_v14, %v2254_v14  ;;  %v573_v20 = vmul.f32 %v2257_v16, %v2257_v16  ;;  %v591_v51 = vmul.f32 %v575_v25, %v2262_v19 }
 0x4ad   :  { %1668 = vmatprep.subr.mxu1 %v978_v30  ;;  %v579_v33 = vmul.f32 %v2273_v27, %v2273_v27  ;;  %v593_v59 = vmul.f32 %v577_v41, %v2267_v22  ;;  %v581_v45 = vmul.f32 %v2279_v24, %v2279_v24  ;;  %v2291_v47 = vadd.f32 %v2175_v13, %v437_v11 }
 0x4ae   :  { %1669 = vmatpush3.msra.mxu1 %v978_v30  ;;  %v587_v35 = vmul.f32 %v571_v18, %v2254_v14  ;;  %v589_v31 = vmul.f32 %v573_v20, %v2257_v16  ;;  %v607_v37 = vmul.f32 0.044715, %v591_v51  ;;  %v583_v21 = vmul.f32 %v2285_v38, %v2285_v38 }
 0x4af   :  { %1670 = vmatprep.subr.mxu1 %v977_v23  ;;  %v595_v49 = vmul.f32 %v579_v33, %v2273_v27  ;;  %v609_v53 = vmul.f32 0.044715, %v593_v59  ;;  %v597_v30 = vmul.f32 %v581_v45, %v2279_v24  ;;  %v585_v54 = vmul.f32 %v2291_v47, %v2291_v47 }
 0x4b0   :  { %1671 = vmatpush3.msra.mxu1 %v977_v23  ;;  %v603_v29 = vmul.f32 0.044715, %v587_v35  ;;  %v605_v43 = vmul.f32 0.044715, %v589_v31  ;;  %v623_v13 = vadd.f32 %v607_v37, %v2262_v19  ;;  %v599_v26 = vmul.f32 %v583_v21, %v2285_v38 }
 0x4b1   :  { %1672 = vmatprep.subr.mxu1 %v976_v15  ;;  %v611_v23 = vmul.f32 0.044715, %v595_v49  ;;  %v613_v56 = vmul.f32 0.044715, %v597_v30  ;;  %v557_v18 = vmul.f32 0.5, %v2257_v16  ;;  %v559_v49 = vmul.f32 0.5, %v2262_v19 }
 0x4b2   :  { %1673 = vmatpush3.msra.mxu1 %v976_v15  ;;  %v619_v1 = vadd.f32 %v603_v29, %v2254_v14  ;;  %v621_v7 = vadd.f32 %v605_v43, %v2257_v16  ;;  %v625_v15 = vadd.f32 %v609_v53, %v2267_v22  ;;  %v639_v57 = vmul.f32 0.7978846, %v623_v13 }
 0x4b3   :  { %1674 = vmatprep.subr.mxu1 %v975_v17  ;;  %v561_v16 = vmul.f32 0.5, %v2267_v22  ;;  %v563_v19 = vmul.f32 0.5, %v2273_v27  ;;  %v565_v22 = vmul.f32 0.5, %v2279_v24 }
 0x4b4   :  { %1675 = vmatpush3.msra.mxu1 %v975_v17  ;;  %v635_v42 = vmul.f32 0.7978846, %v619_v1  ;;  %v637_v55 = vmul.f32 0.7978846, %v621_v7  ;;  %v601_v17 = vmul.f32 %v585_v54, %v2291_v47 }
 0x4b5   :  { %1676 = vmatprep.subr.mxu1 %v974_v58 }
 0x4b6   :  { %1677 = vmatpush3.msra.mxu1 %v974_v58  ;;  %1799 = vtanh.f32 %v635_v42  ;;  %v627_v58 = vadd.f32 %v611_v23, %v2273_v27  ;;  %v567_v27 = vmul.f32 0.5, %v2285_v38 }
 0x4b7   :  { %1678 = vmatprep.subr.mxu1 %v973_v52  ;;  %1801 = vtanh.f32 %v637_v55 }
 0x4b8   :  { %1679 = vmatpush3.msra.mxu1 %v973_v52  ;;  %v615_v52 = vmul.f32 0.044715, %v599_v26  ;;  %1803 = vtanh.f32 %v639_v57 }
 0x4b9   :  { %1681 = vmatmul.mubr.msk.f32.vlgmr.msra.gmra.mxu1 %vm1037_vm0, %v982_v39  ;;  %1692 = vmatprep.subr.mxu1 %v1198_v32  ;;  %v641_v39 = vmul.f32 0.7978846, %v625_v15 }
 0x4ba   :  { %1683 = vmatprep.mubr.msk.f32.mxu1 %vm1037_vm0, %v983_v60  ;;  %1693 = vmatpush3.msra.mxu1 %v1198_v32  ;;  %v629_v32 = vadd.f32 %v613_v56, %v2279_v24  ;;  %v617_v60 = vmul.f32 0.044715, %v601_v17 }
 0x4bb   :  { %1694 = vmatprep.subr.mxu1 %v1197_v12  ;;  %1805 = vtanh.f32 %v641_v39 }
 0x4bc   :  { %1695 = vmatpush3.msra.mxu1 %v1197_v12  ;;  %v643_v12 = vmul.f32 0.7978846, %v627_v58 }
 0x4bd   :  { %1684 = vmatmul.mubr.msk.f32.gmra.mxu1 %vm1037_vm0, %v984_v61  ;;  %1696 = vmatprep.subr.mxu1 %v1196_v62  ;;  %v631_v61 = vadd.f32 %v615_v52, %v2285_v38 }
 0x4be   :  { %1686 = vmatprep.mubr.msk.f32.mxu1 %vm1037_vm0, %v985_v63  ;;  %1697 = vmatpush3.msra.mxu1 %v1196_v62  ;;  %v645_v62 = vmul.f32 0.7978846, %v629_v32  ;;  %v633_v63 = vadd.f32 %v617_v60, %v2291_v47  ;;  %1807 = vtanh.f32 %v643_v12 }
 0x4bf   :  { %1698 = vmatprep.subr.mxu1 %v1195_v40 }
 0x4c0   :  { %1699 = vmatpush3.msra.mxu1 %v1195_v40  ;;  %v647_v40 = vmul.f32 0.7978846, %v631_v61  ;;  %1809 = vtanh.f32 %v645_v62 }
 0x4c1   :  { %1687 = vmatmul.mubr.msk.f32.gmra.mxu1 %vm1037_vm0, %v986_v2  ;;  %1700 = vmatprep.subr.mxu1 %v1194_v48  ;;  %v1000_v2 = vpop.permute.xlu0 %999 }
 0x4c2   :  { %1689 = vmatprep.mubr.msk.f32.mxu1 %vm1037_vm0, %v987_v36  ;;  %1701 = vmatpush3.msra.mxu1 %v1194_v48  ;;  %v649_v48 = vmul.f32 0.7978846, %v633_v63  ;;  %v1010_v36 = vpop.permute.xlu1 %1009  ;;  %1811 = vtanh.f32 %v647_v40 }
 0x4c3   :  { %1702 = vmatprep.subr.mxu1 %v1193_v3 }
 0x4c4   :  { %1703 = vmatpush3.msra.mxu1 %v1193_v3  ;;  %v1800_v3 = vpop.eup %1799  ;;  %1813 = vtanh.f32 %v649_v48 }
 0x4c5   :  { %1690 = vmatmul.mubr.msk.f32.gmra.mxu1 %vm1037_vm0, %v988_v4  ;;  %1704 = vmatprep.subr.mxu1 %v1192_v5  ;;  %v1802_v4 = vpop.eup %1801 }
 0x4c6   :  { %1705 = vmatpush3.msra.mxu1 %v1192_v5  ;;  %v1005_v5 = vpop.permute.xlu0 %1004 }
 0x4c7   :  { %1706 = vmatprep.subr.mxu1 %v1191_v46 }
 0x4c8   :  { %1707 = vmatpush3.msra.mxu1 %v1191_v46  ;;  %v1015_v46 = vpop.permute.xlu1 %1014 }
 0x4c9   :  { %1708 = vmatprep.subr.mxu1 %v1190_v44 }
 0x4ca   :  { %1709 = vmatpush3.msra.mxu1 %v1190_v44 }
 0x4cb   :  { %1710 = vmatprep.subr.mxu1 %v1189_v8 }
 0x4cc   :  { %1711 = vmatpush3.msra.mxu1 %v1189_v8  ;;  %v1025_v33 = vpop.permute.xlu1 %1024 }
 0x4cd   :  { %1712 = vmatprep.subr.mxu1 %v1188_v34 }
 0x4ce   :  { %1713 = vmatpush3.msra.mxu1 %v1188_v34  ;;  %v667_v34 = vadd.f32 1.0, %v1800_v3 }
 0x4cf   :  { %1714 = vmatprep.subr.mxu1 %v1187_v9 }
 0x4d0   :  { %1715 = vmatpush3.msra.mxu1 %v1187_v9  ;;  %v1804_v9 = vpop.eup %1803  ;;  %v1035_v52 = vpop.permute.xlu1 %1034 }
 0x4d1   :  { %1716 = vmatprep.subr.mxu1 %v1186_v10  ;;  %v671_v29 = vadd.f32 1.0, %v1804_v9 }
 0x4d2   :  { %1717 = vmatpush3.msra.mxu1 %v1186_v10  ;;  %v669_v10 = vadd.f32 1.0, %v1802_v4 }
 0x4d3   :  { %1718 = vmatprep.subr.mxu1 %v1185_v0  ;;  %v687_v54 = vmul.f32 %v671_v29, %v559_v49 }
 0x4d4   :  { %1719 = vmatpush3.msra.mxu1 %v1185_v0  ;;  %v685_v43 = vmul.f32 %v669_v10, %v557_v18 }
 0x4d5   :  { %1720 = vmatprep.subr.mxu1 %v1184_v50 }
 0x4d6   :  { %1721 = vmatpush3.msra.mxu1 %v1184_v50  ;;  %v1806_v50 = vpop.eup %1805 }
 0x4d7   :  { %1722 = vmatprep.subr.mxu1 %v1183_v6  ;;  %v1808_v51 = vpop.eup %1807  ;;  %v673_v59 = vadd.f32 1.0, %v1806_v50  ;;  %v1815_v50 = vld [vmem:[#allocation2] sm:$0xff] }
 0x4d8   :  { %1723 = vmatpush3.msra.mxu1 %v1183_v6  ;;  %v555_v6 = vmul.f32 0.5, %v2254_v14  ;;  %v1810_v1 = vpop.eup %1809  ;;  %v1020_v14 = vpop.permute.xlu0 %1019  ;;  %v675_v23 = vadd.f32 1.0, %v1808_v51  ;;  %v1818_v51 = vld [vmem:[%s2348_s0 + $0x18] sm:$0xff] }
 0x4d9   :  { %v1812_v26 = vpop.eup %1811  ;;  %v689_v55 = vmul.f32 %v673_v59, %v561_v16  ;;  %v677_v15 = vadd.f32 1.0, %v1810_v1 }
 0x4da   :  { %v683_v25 = vmul.f32 %v667_v34, %v555_v6  ;;  %v1814_v17 = vpop.eup %1813  ;;  %v691_v12 = vmul.f32 %v675_v23, %v563_v19  ;;  %v679_v63 = vadd.f32 1.0, %v1812_v26 }
 0x4db   :  { %v681_v48 = vadd.f32 1.0, %v1814_v17 }
 0x4dc   :  { %v1030_v40 = vpop.permute.xlu0 %1029 }
 0x579   :  { %v1682_v44 = vpop.f32.mrf.mxu1 }
 0x57a   :  { %v1134_v8 = vadd.f32 %v1682_v44, %v1005_v5  ;;  %v695_v44 = vmul.f32 %v679_v63, %v567_v27 }
 0x57b   :  { %v1128_v0 = vpop.f32.mrf.mxu1 }
 0x57c   :  { %v1129_v11 = vadd.f32 %v1128_v0, %v1000_v2  ;;  %v1168_v20 = vadd.f32 1.0, %v1134_v8  ;;  %v693_v2 = vmul.f32 %v677_v15, %v565_v22  ;;  %v1201_v0 = vsub.s32 5, %v2123_v28 }
 0x57d   :  { %v1685_v35 = vpop.f32.mrf.mxu1 }
 0x57e   :  { %v1167_v31 = vadd.f32 1.0, %v1129_v11  ;;  %v1144_v41 = vadd.f32 %v1685_v35, %v1015_v46  ;;  %v1176_v7 = vmul.f32 %v1168_v20, %v685_v43  ;;  %v569_v46 = vmul.f32 0.5, %v2291_v47  ;;  %v1816_v47 = vld [vmem:[%s2348_s0 + $0x8] sm:$0xff] }
 0x57f   :  { %v1138_v45 = vpop.f32.mrf.mxu1  ;;  %v1202_v6 = vrot.slane %v1815_v50, %v1201_v0 }
 0x580   :  { %v1175_v37 = vmul.f32 %v1167_v31, %v683_v25  ;;  %v1139_v21 = vadd.f32 %v1138_v45, %v1010_v36  ;;  %v1170_v53 = vadd.f32 1.0, %v1144_v41  ;;  %v697_v34 = vmul.f32 %v681_v48, %v569_v46  ;;  %v1817_v31 = vld [vmem:[%s2348_s0] sm:$0xff]  ;;  %v1819_v45 = vld [vmem:[%s2348_s0 + $0x10] sm:$0xff] }
 0x581   :  { %v1688_v30 = vpop.f32.mrf.mxu1 }
 0x582   :  { %v1169_v42 = vadd.f32 1.0, %v1139_v21  ;;  %v1154_v13 = vadd.f32 %v1688_v30, %v1025_v33  ;;  %1724 = vmatprep.mubr.f32.mxu1 %v1175_v37  ;;  %v1178_v39 = vmul.f32 %v1170_v53, %v689_v55  ;;  %v1820_v21 = vld [vmem:[%s2348_s0 + $0x28] sm:$0xff]  ;;  %v1821_v53 = vld [vmem:[%s2348_s0 + $0x20] sm:$0xff]  ;;  %v1823_v55 = vld [vmem:[%s2348_s0 + $0x30] sm:$0xff] }
 0x583   :  { %v1148_v56 = vpop.f32.mrf.mxu1  ;;  %1725 = vmatmul.mubr.f32.vlgmr.msra.gmra.mxu1 %v1176_v7 }
 0x584   :  { %v1177_v57 = vmul.f32 %v1169_v42, %v687_v54  ;;  %v1149_v58 = vadd.f32 %v1148_v56, %v1020_v14  ;;  %v1172_v32 = vadd.f32 1.0, %v1154_v13  ;;  %v1822_v13 = vld [vmem:[%s2348_s0 + $0x38] sm:$0xff] }
 0x585   :  { %v1691_v60 = vpop.f32.mrf.mxu1 }
 0x586   :  { %v1171_v61 = vadd.f32 1.0, %v1149_v58  ;;  %v1164_v62 = vadd.f32 %v1691_v60, %v1035_v52  ;;  %1727 = vmatprep.mubr.f32.mxu1 %v1177_v57  ;;  %v1180_v5 = vmul.f32 %v1172_v32, %v693_v2 }
 0x587   :  { %v1158_v36 = vpop.f32.mrf.mxu1  ;;  %1728 = vmatmul.mubr.f32.gmra.mxu1 %v1178_v39 }
 0x588   :  { %v1179_v3 = vmul.f32 %v1171_v61, %v691_v12  ;;  %v1159_v4 = vadd.f32 %v1158_v36, %v1030_v40  ;;  %v1174_v24 = vadd.f32 1.0, %v1164_v62 }
 0x58a   :  { %v1173_v8 = vadd.f32 1.0, %v1159_v4  ;;  %1730 = vmatprep.mubr.f32.mxu1 %v1179_v3  ;;  %v1182_v10 = vmul.f32 %v1174_v24, %v697_v34 }
 0x58b   :  { %1731 = vmatmul.mubr.f32.gmra.mxu1 %v1180_v5 }
 0x58c   :  { %v1181_v9 = vmul.f32 %v1173_v8, %v695_v44 }
 0x58e   :  { %1733 = vmatprep.mubr.f32.mxu1 %v1181_v9 }
 0x58f   :  { %1734 = vmatmul.mubr.f32.gmra.mxu1 %v1182_v10 }
 0x643   :  { %v1726_v11 = vpop.f32.mrf.mxu1 }
 0x644   :  { %v1275_v38 = vadd.f32 %v1726_v11, %v1202_v6 }
 0x645   :  { %v1269_v18 = vpop.f32.mrf.mxu1 }
 0x646   :  { %v1309_v20 = vadd.f32 %v1816_v47, %v1275_v38  ;;  %v1270_v35 = vadd.f32 %v1269_v18, %v1202_v6 }
 0x647   :  { %v1729_v25 = vpop.f32.mrf.mxu1 }
 0x648   :  { %1317 = vst [vmem:[#allocation13 + $0x8] sm:$0xff] %v1309_v20  ;;  %v1308_v41 = vadd.f32 %v1817_v31, %v1270_v35  ;;  %v1285_v29 = vadd.f32 %v1729_v25, %v1202_v6 }
 0x649   :  { %v1279_v28 = vpop.f32.mrf.mxu1 }
 0x64a   :  { %1316 = vst [vmem:[#allocation13] sm:$0xff] %v1308_v41  ;;  %v1311_v33 = vadd.f32 %v1818_v51, %v1285_v29  ;;  %v1280_v43 = vadd.f32 %v1279_v28, %v1202_v6 }
 0x64b   :  { %v1732_v59 = vpop.f32.mrf.mxu1 }
 0x64c   :  { %1319 = vst [vmem:[#allocation13 + $0x18] sm:$0xff] %v1311_v33  ;;  %v1310_v1 = vadd.f32 %v1819_v45, %v1280_v43  ;;  %v1295_v37 = vadd.f32 %v1732_v59, %v1202_v6 }
 0x64d   :  { %v1289_v49 = vpop.f32.mrf.mxu1 }
 0x64e   :  { %1318 = vst [vmem:[#allocation13 + $0x10] sm:$0xff] %v1310_v1  ;;  %v1313_v14 = vadd.f32 %v1820_v21, %v1295_v37  ;;  %v1290_v7 = vadd.f32 %v1289_v49, %v1202_v6 }
 0x64f   :  { %v1735_v16 = vpop.f32.mrf.mxu1 }
 0x650   :  { %1321 = vst [vmem:[#allocation13 + $0x28] sm:$0xff] %v1313_v14  ;;  %v1312_v30 = vadd.f32 %v1821_v53, %v1290_v7  ;;  %v1305_v54 = vadd.f32 %v1735_v16, %v1202_v6 }
 0x651   :  { %v1299_v42 = vpop.f32.mrf.mxu1 }
 0x652   :  { %1320 = vst [vmem:[#allocation13 + $0x20] sm:$0xff] %v1312_v30  ;;  %v1315_v23 = vadd.f32 %v1822_v13, %v1305_v54  ;;  %v1300_v26 = vadd.f32 %v1299_v42, %v1202_v6 }
 0x654   :  { %1323 = vst [vmem:[#allocation13 + $0x38] sm:$0xff] %v1315_v23  ;;  %v1314_v15 = vadd.f32 %v1823_v55, %v1300_v26 }
 0x656   :  { %1322 = vst [vmem:[#allocation13 + $0x30] sm:$0xff] %v1314_v15 }
 0x657   :  { %1955 = shalt.err (!%p1952_p6)
}
 0x658   :  { %1335 = dma.vmem_to_hbm [thread:$0]  %s1330_s1, 1024, %s2356_s8, [#allocation4], %s1979_s17, %s1979_s17, %s1980_s18  }
 0x659   :  { %1972 = dma.done.wait [#allocation4], 1024  }
 0x65a   :  { %1973 = vsyncadd [#allocation4], 4294966272 }
 0x65b   :  { %1339 = vsyncpa [#allocation3], 1 }
 0x65c   :  { %1340 = vsyncpa [#allocation6], 1 }
 0x65d   :  { %1341 = vsyncpa [#allocation9], 1 }
 0x65e   :  { %1342 = vsyncpa [#allocation12], 1 }
 0x65f   :  { %1343 = vsyncpa [#allocation4], 1 }

</bundles_post_ra>
